<compile_context>
chip_gen: v6e
topology: v6e:2x2x1
jax: 0.10.0
libtpu: 0.0.40
codegen_flags: <defaults>
</compile_context>

<pallas_src>
import functools

import jax
import jax.numpy as jnp
from jax.experimental import pallas as pl
from jax.experimental.pallas import tpu as pltpu

LEAKY_SLOPE = 0.2
LANE_PAD = 128   # zero gap (lanes) before/after/between samples in the padded scratch


def _leaky(v):
    return jnp.where(v > 0, v, LEAKY_SLOPE * v)


# -----------------------------------------------------------------------------
# Fused kernel: one grid step == S samples, channel-as-sublane layout.
# -----------------------------------------------------------------------------
def _basic_block_kernel(x_ref, w1p_ref, b1p_ref, w2_ref, b2_ref, o_ref,
                        zbuf_ref, stack_ref, *, H, W, S, pad):
    # x_ref    : (S, Cin, H*W)              S samples, channels on sublanes
    # w1p_ref  : (2*Cout, 9*Cin)            conv1 (BN1 folded) stacked over 1x1 proj
    # b1p_ref  : (2*Cout, 1)                [folded BN1 bias ; proj bias]
    # w2_ref   : (Cout, 9*Cout)             conv2 weight, BN2 scale folded in
    # b2_ref   : (Cout, 1)                  folded BN2 bias
    # o_ref    : (S, Cout, H*W)
    # zbuf_ref : (Cout, pad + S*(H*W+pad))  zero-padded flat activation buffer
    # stack_ref: (9*Cout, S*H*W)            im2col activation stack
    HW = H * W
    stride = HW + pad                       # per-sample stride inside the padded buffer
    cin = x_ref.shape[1]
    cout = o_ref.shape[1]

    # Horizontal (within-row) validity masks for the w-1 / w+1 taps (shared by both convs).
    col = jax.lax.broadcasted_iota(jnp.int32, (1, HW), 1) % W
    valid_l = col > 0                       # tap reads column w-1
    valid_r = col < (W - 1)                 # tap reads column w+1

    # Zero ONLY the 128-lane pad strips (aligned, unmasked stores); every interior is
    # fully rewritten below.  Done every step on purpose (see header note on megacore).
    for n in range(S + 1):
        zbuf_ref[:, n * stride: n * stride + pad] = jnp.zeros((cout, pad), jnp.float32)

    def conv3x3(C, src_samples, w_ref, b_ref):
        # 1) write the sample interiors into the zero-padded buffer
        for n in range(S):
            zbuf_ref[:C, pad + n * stride: pad + n * stride + HW] = src_samples[n]
        buf = zbuf_ref[:C, :]
        # 2) build the (9*C, S*HW) im2col stack: one shifted+masked slice per tap/sample
        for kh in range(3):
            for kw in range(3):
                t = kh * 3 + kw
                delta = (kh - 1) * W + (kw - 1)
                for n in range(S):
                    base = pad + n * stride + delta
                    s = buf[:, base: base + HW]
                    if kw == 0:
                        s = jnp.where(valid_l, s, 0.0)
                    elif kw == 2:
                        s = jnp.where(valid_r, s, 0.0)
                    stack_ref[t * C:(t + 1) * C, n * HW:(n + 1) * HW] = s
        # 3) one MXU push for the whole conv (+ folded bias)
        return jnp.dot(w_ref[...], stack_ref[:9 * C, :],
                       preferred_element_type=jnp.float32) + b_ref[...]

    # conv1+BN1 fused with the 1x1 projection: rows [0,Cout)=conv1, [Cout,2*Cout)=proj
    r1 = conv3x3(cin, [x_ref[n] for n in range(S)], w1p_ref, b1p_ref)
    y1 = _leaky(r1[:cout])
    proj = r1[cout:]

    # conv2 + BN2
    y2 = conv3x3(cout, [y1[:, n * HW:(n + 1) * HW] for n in range(S)], w2_ref, b2_ref)

    # residual add + final LeakyReLU, lane-dense (multiple-of-128) stores per sample
    out = _leaky(y2 + proj)
    for n in range(S):
        o_ref[n] = out[:, n * HW:(n + 1) * HW].astype(o_ref.dtype)


# -----------------------------------------------------------------------------
# Wrapper: parameter folding + single pallas_call.
# -----------------------------------------------------------------------------
def fold_kernel_params(p):
    """Fold inference-BN scale into the conv weights, lay them out as im2col matrices
    (Cout, 9*C_in) with tap-major columns, and stack the 1x1 projection into conv1's
    weight (nonzero only in the centre-tap column block)."""
    def conv_mat(w_oihw, scale):
        w = w_oihw * scale[:, None, None, None]          # exact: scale commutes with conv
        o, i, kh, kw = w.shape
        # column index = (kh*3+kw)*i + ic  <-> stack row index = t*C + ic
        return jnp.transpose(w, (0, 2, 3, 1)).reshape(o, kh * kw * i)

    out_c, in_c = p["wp"].shape
    w1 = conv_mat(p["w1"], p["s1"])                                  # (Cout, 9*Cin)
    wp_rows = jnp.zeros((out_c, 9 * in_c), jnp.float32)
    wp_rows = wp_rows.at[:, 4 * in_c:5 * in_c].set(p["wp"])          # centre tap block
    return dict(
        w1p=jnp.concatenate([w1, wp_rows], axis=0),                  # (2*Cout, 9*Cin)
        b1p=jnp.concatenate([p["b1"], p["bp"]]).reshape(2 * out_c, 1),
        w2=conv_mat(p["w2"], p["s2"]),                               # (Cout, 9*Cout)
        b2=p["b2"].reshape(out_c, 1),
    )


def _samples_per_step(n):
    """v7x has 2 TensorCores/chip: keep 1 sample per step + 'parallel' grid so both cores
    work.  Single-TC v5e/v6e: the grid is a serial loop, so merge the whole batch into
    one step (wider matmuls, no per-step overhead)."""
    try:
        kind = jax.devices()[0].device_kind.lower()
    except Exception:
        return 1
    if "v7" in kind or "7x" in kind:
        return 1
    return n


def basic_block_forward(x_nchw, p):
    N, Cin, H, W = x_nchw.shape
    HW = H * W
    assert W + 1 <= LANE_PAD, "pad strips must absorb the +/-(W+1) tap shifts"

    kp = fold_kernel_params(p)
    Cout = kp["w2"].shape[0]

    S = _samples_per_step(N)                    # samples per grid step
    padw = LANE_PAD + S * (HW + LANE_PAD)       # width of the zero-padded scratch

    x_flat = x_nchw.reshape(N, Cin, HW).astype(jnp.float32)   # NCHW, free reshape

    kernel = functools.partial(_basic_block_kernel, H=H, W=W, S=S, pad=LANE_PAD)
    out = pl.pallas_call(
        kernel,
        out_shape=jax.ShapeDtypeStruct((N, Cout, HW), jnp.float32),
        grid=(N // S,),
        in_specs=[
            pl.BlockSpec((S, Cin, HW), lambda i: (i, 0, 0)),
            pl.BlockSpec((2 * Cout, 9 * Cin), lambda i: (0, 0)),
            pl.BlockSpec((2 * Cout, 1), lambda i: (0, 0)),
            pl.BlockSpec((Cout, 9 * Cout), lambda i: (0, 0)),
            pl.BlockSpec((Cout, 1), lambda i: (0, 0)),
        ],
        out_specs=pl.BlockSpec((S, Cout, HW), lambda i: (i, 0, 0)),
        scratch_shapes=[
            pltpu.VMEM((Cout, padw), jnp.float32),        # shared zero-padded buffer
            pltpu.VMEM((9 * Cout, S * HW), jnp.float32),  # shared im2col stack
        ],
        compiler_params=pltpu.CompilerParams(dimension_semantics=("parallel",)),
    )(x_flat, kp["w1p"], kp["b1p"], kp["w2"], kp["b2"])

    return out.reshape(N, Cout, H, W)                          # NCHW, free reshape


# -----------------------------------------------------------------------------
# Deterministic parameters (PyTorch-style layouts) and pure-JAX reference.
# -----------------------------------------------------------------------------
def make_params(key, in_c, out_c):
    ks = jax.random.split(key, 12)
    eps = 1e-5

    def fold_bn(kg, kb, km, kv, c):
        gamma = 1.0 + 0.1 * jax.random.normal(kg, (c,), jnp.float32)
        beta = 0.1 * jax.random.normal(kb, (c,), jnp.float32)
        mean = 0.1 * jax.random.normal(km, (c,), jnp.float32)
        var = 1.0 + 0.1 * jnp.abs(jax.random.normal(kv, (c,), jnp.float32))
        scale = gamma / jnp.sqrt(var + eps)
        bias = beta - mean * scale
        return scale, bias

    w1 = 0.1 * jax.random.normal(ks[0], (out_c, in_c, 3, 3), jnp.float32)   # OIHW
    w2 = 0.1 * jax.random.normal(ks[1], (out_c, out_c, 3, 3), jnp.float32)  # OIHW
    s1, b1 = fold_bn(ks[2], ks[3], ks[4], ks[5], out_c)
    s2, b2 = fold_bn(ks[6], ks[7], ks[8], ks[9], out_c)
    wp = 0.1 * jax.random.normal(ks[10], (out_c, in_c), jnp.float32)        # 1x1 conv
    bp = 0.1 * jax.random.normal(ks[11], (out_c,), jnp.float32)
    return dict(w1=w1, s1=s1, b1=b1, w2=w2, s2=s2, b2=b2, wp=wp, bp=bp)


def reference_forward(x_nchw, p):
    x = x_nchw.astype(jnp.float32)
    dn = ("NCHW", "OIHW", "NCHW")

    def conv3x3(v, w):
        return jax.lax.conv_general_dilated(v, w, (1, 1), ((1, 1), (1, 1)),
                                            dimension_numbers=dn)

    def bn(v, s, b):
        return v * s[None, :, None, None] + b[None, :, None, None]

    y = _leaky(bn(conv3x3(x, p["w1"]), p["s1"], p["b1"]))
    y = bn(conv3x3(y, p["w2"]), p["s2"], p["b2"])
    proj = jnp.einsum("nchw,oc->nohw", x, p["wp"]) + p["bp"][None, :, None, None]
    return _leaky(y + proj)


if __name__ == "__main__":
    key = jax.random.PRNGKey(0)
    kx, kp = jax.random.split(key)

    N, IN_C, OUT_C, H, W = 2, 4, 8, 16, 16
    x = jax.random.normal(kx, (N, IN_C, H, W), jnp.float32)   # NCHW input
    params = make_params(kp, IN_C, OUT_C)

    out = jax.block_until_ready(basic_block_forward(x, params))
    ref = jax.block_until_ready(reference_forward(x, params))

    assert out.shape == (N, OUT_C, H, W)
    assert jnp.allclose(out, ref, atol=1e-4, rtol=1e-4), "mismatch vs reference"

    print("KERNEL_OK")
</pallas_src>

<mosaic_0001>
module attributes {stable_mosaic.version = 11 : i64} {
  func.func @_basic_block_kernel(%arg0: i32, %arg1: memref<2x4x256xf32, #tpu.memory_space<vmem>>, %arg2: memref<16x36xf32, #tpu.memory_space<vmem>>, %arg3: memref<16x1xf32, #tpu.memory_space<vmem>>, %arg4: memref<8x72xf32, #tpu.memory_space<vmem>>, %arg5: memref<8x1xf32, #tpu.memory_space<vmem>>, %arg6: memref<2x8x256xf32, #tpu.memory_space<vmem>>, %arg7: memref<8x896xf32, #tpu.memory_space<vmem>>, %arg8: memref<72x512xf32, #tpu.memory_space<vmem>>) attributes {dimension_semantics = [#tpu.dimension_semantics<parallel>], iteration_bounds = array<i64: 1>, scalar_prefetch = 0 : i64, scratch_operands = 2 : i64, tpu.core_type = #tpu.core_type<tc>, window_params = [{transform_indices = @transform_0, window_bounds = array<i64: 2, 4, 256>}, {pipeline_mode = #tpu.pipeline_mode<synchronous>, transform_indices = @transform_1, window_bounds = array<i64: 16, 36>}, {pipeline_mode = #tpu.pipeline_mode<synchronous>, transform_indices = @transform_2, window_bounds = array<i64: 16, 1>}, {pipeline_mode = #tpu.pipeline_mode<synchronous>, transform_indices = @transform_3, window_bounds = array<i64: 8, 72>}, {pipeline_mode = #tpu.pipeline_mode<synchronous>, transform_indices = @transform_4, window_bounds = array<i64: 8, 1>}, {transform_indices = @transform_5, window_bounds = array<i64: 2, 8, 256>}]} {
    %0 = tpu.iota {dimensions = array<i32: 1>} : vector<1x256xi32>
    %c16_i32 = arith.constant 16 : i32
    %c0_i32 = arith.constant 0 : i32
    %1 = arith.cmpi eq, %c16_i32, %c0_i32 : i32
    %c1_i32 = arith.constant 1 : i32
    %2 = arith.select %1, %c1_i32, %c16_i32 : i32
    %3 = vector.broadcast %2 : i32 to vector<1x256xi32>
    %4 = arith.remsi %0, %3 : vector<1x256xi32>
    %c0_i32_0 = arith.constant 0 : i32
    %5 = vector.broadcast %c0_i32_0 : i32 to vector<1x256xi32>
    %6 = arith.cmpi ne, %4, %5 : vector<1x256xi32>
    %c0_i32_1 = arith.constant 0 : i32
    %7 = vector.broadcast %c0_i32_1 : i32 to vector<1x256xi32>
    %8 = arith.cmpi slt, %4, %7 : vector<1x256xi32>
    %c0_i32_2 = arith.constant 0 : i32
    %9 = arith.cmpi slt, %2, %c0_i32_2 : i32
    %10 = vector.broadcast %9 : i1 to vector<1x256xi1>
    %11 = vector.broadcast %10 : vector<1x256xi1> to vector<1x256xi1>
    %12 = arith.xori %8, %11 : vector<1x256xi1>
    %13 = arith.andi %12, %6 : vector<1x256xi1>
    %14 = vector.broadcast %2 : i32 to vector<1x256xi32>
    %15 = arith.addi %4, %14 : vector<1x256xi32>
    %16 = arith.select %13, %15, %4 : vector<1x256xi1>, vector<1x256xi32>
    %c0_i32_3 = arith.constant 0 : i32
    %17 = vector.broadcast %c0_i32_3 : i32 to vector<1x256xi32>
    %18 = arith.cmpi sgt, %16, %17 : vector<1x256xi32>
    %c15_i32 = arith.constant 15 : i32
    %19 = vector.broadcast %c15_i32 : i32 to vector<1x256xi32>
    %20 = arith.cmpi slt, %16, %19 : vector<1x256xi32>
    %cst = arith.constant 0.000000e+00 : f32
    %21 = vector.broadcast %cst : f32 to vector<8x128xf32>
    %c0 = arith.constant 0 : index
    %c0_4 = arith.constant 0 : index
    %22 = vector.load %arg7[%c0, %c0_4] : memref<8x896xf32, #tpu.memory_space<vmem>>, vector<8x128xf32>
    tpu.vector_store %arg7[%c0, %c0_4], %21 {strides = array<i32>} : memref<8x896xf32, #tpu.memory_space<vmem>>, vector<8x128xf32>,
    %cst_5 = arith.constant 0.000000e+00 : f32
    %23 = vector.broadcast %cst_5 : f32 to vector<8x128xf32>
    %c0_6 = arith.constant 0 : index
    %c384 = arith.constant 384 : index
    %24 = vector.load %arg7[%c0_6, %c384] : memref<8x896xf32, #tpu.memory_space<vmem>>, vector<8x128xf32>
    tpu.vector_store %arg7[%c0_6, %c384], %23 {strides = array<i32>} : memref<8x896xf32, #tpu.memory_space<vmem>>, vector<8x128xf32>,
    %cst_7 = arith.constant 0.000000e+00 : f32
    %25 = vector.broadcast %cst_7 : f32 to vector<8x128xf32>
    %c0_8 = arith.constant 0 : index
    %c768 = arith.constant 768 : index
    %26 = vector.load %arg7[%c0_8, %c768] : memref<8x896xf32, #tpu.memory_space<vmem>>, vector<8x128xf32>
    tpu.vector_store %arg7[%c0_8, %c768], %25 {strides = array<i32>} : memref<8x896xf32, #tpu.memory_space<vmem>>, vector<8x128xf32>,
    %c0_9 = arith.constant 0 : index
    %c0_10 = arith.constant 0 : index
    %c0_11 = arith.constant 0 : index
    %27 = vector.load %arg1[%c0_9, %c0_10, %c0_11] : memref<2x4x256xf32, #tpu.memory_space<vmem>>, vector<1x4x256xf32>
    %28 = vector.shape_cast %27 : vector<1x4x256xf32> to vector<4x256xf32>
    %c1 = arith.constant 1 : index
    %c0_12 = arith.constant 0 : index
    %c0_13 = arith.constant 0 : index
    %29 = vector.load %arg1[%c1, %c0_12, %c0_13] : memref<2x4x256xf32, #tpu.memory_space<vmem>>, vector<1x4x256xf32>
    %30 = vector.shape_cast %29 : vector<1x4x256xf32> to vector<4x256xf32>
    %c0_14 = arith.constant 0 : index
    %c128 = arith.constant 128 : index
    %31 = vector.load %arg7[%c0_14, %c128] : memref<8x896xf32, #tpu.memory_space<vmem>>, vector<4x256xf32>
    tpu.vector_store %arg7[%c0_14, %c128], %28 {strides = array<i32>} : memref<8x896xf32, #tpu.memory_space<vmem>>, vector<4x256xf32>,
    %c0_15 = arith.constant 0 : index
    %c512 = arith.constant 512 : index
    %32 = vector.load %arg7[%c0_15, %c512] : memref<8x896xf32, #tpu.memory_space<vmem>>, vector<4x256xf32>
    tpu.vector_store %arg7[%c0_15, %c512], %30 {strides = array<i32>} : memref<8x896xf32, #tpu.memory_space<vmem>>, vector<4x256xf32>,
    %c0_16 = arith.constant 0 : index
    %c0_17 = arith.constant 0 : index
    %33 = vector.load %arg7[%c0_16, %c0_17] : memref<8x896xf32, #tpu.memory_space<vmem>>, vector<4x896xf32>
    %34 = vector.extract_strided_slice %33 {offsets = [0, 111], sizes = [4, 256], strides = [1, 1]} : vector<4x896xf32> to vector<4x256xf32>
    %cst_18 = arith.constant 0.000000e+00 : f32
    %35 = vector.shape_cast %18 : vector<1x256xi1> to vector<1x256xi1>
    %36 = vector.broadcast %35 : vector<1x256xi1> to vector<4x256xi1>
    %37 = vector.broadcast %cst_18 : f32 to vector<4x256xf32>
    %38 = arith.select %36, %34, %37 : vector<4x256xi1>, vector<4x256xf32>
    %c0_19 = arith.constant 0 : index
    %c0_20 = arith.constant 0 : index
    %39 = vector.load %arg8[%c0_19, %c0_20] : memref<72x512xf32, #tpu.memory_space<vmem>>, vector<4x256xf32>
    tpu.vector_store %arg8[%c0_19, %c0_20], %38 {strides = array<i32>} : memref<72x512xf32, #tpu.memory_space<vmem>>, vector<4x256xf32>,
    %40 = vector.extract_strided_slice %33 {offsets = [0, 495], sizes = [4, 256], strides = [1, 1]} : vector<4x896xf32> to vector<4x256xf32>
    %cst_21 = arith.constant 0.000000e+00 : f32
    %41 = vector.shape_cast %18 : vector<1x256xi1> to vector<1x256xi1>
    %42 = vector.broadcast %41 : vector<1x256xi1> to vector<4x256xi1>
    %43 = vector.broadcast %cst_21 : f32 to vector<4x256xf32>
    %44 = arith.select %42, %40, %43 : vector<4x256xi1>, vector<4x256xf32>
    %c0_22 = arith.constant 0 : index
    %c256 = arith.constant 256 : index
    %45 = vector.load %arg8[%c0_22, %c256] : memref<72x512xf32, #tpu.memory_space<vmem>>, vector<4x256xf32>
    tpu.vector_store %arg8[%c0_22, %c256], %44 {strides = array<i32>} : memref<72x512xf32, #tpu.memory_space<vmem>>, vector<4x256xf32>,
    %46 = vector.extract_strided_slice %33 {offsets = [0, 112], sizes = [4, 256], strides = [1, 1]} : vector<4x896xf32> to vector<4x256xf32>
    %c4 = arith.constant 4 : index
    %c0_23 = arith.constant 0 : index
    %47 = vector.load %arg8[%c4, %c0_23] : memref<72x512xf32, #tpu.memory_space<vmem>>, vector<4x256xf32>
    tpu.vector_store %arg8[%c4, %c0_23], %46 {strides = array<i32>} : memref<72x512xf32, #tpu.memory_space<vmem>>, vector<4x256xf32>,
    %48 = vector.extract_strided_slice %33 {offsets = [0, 496], sizes = [4, 256], strides = [1, 1]} : vector<4x896xf32> to vector<4x256xf32>
    %c4_24 = arith.constant 4 : index
    %c256_25 = arith.constant 256 : index
    %49 = vector.load %arg8[%c4_24, %c256_25] : memref<72x512xf32, #tpu.memory_space<vmem>>, vector<4x256xf32>
    tpu.vector_store %arg8[%c4_24, %c256_25], %48 {strides = array<i32>} : memref<72x512xf32, #tpu.memory_space<vmem>>, vector<4x256xf32>,
    %50 = vector.extract_strided_slice %33 {offsets = [0, 113], sizes = [4, 256], strides = [1, 1]} : vector<4x896xf32> to vector<4x256xf32>
    %cst_26 = arith.constant 0.000000e+00 : f32
    %51 = vector.shape_cast %20 : vector<1x256xi1> to vector<1x256xi1>
    %52 = vector.broadcast %51 : vector<1x256xi1> to vector<4x256xi1>
    %53 = vector.broadcast %cst_26 : f32 to vector<4x256xf32>
    %54 = arith.select %52, %50, %53 : vector<4x256xi1>, vector<4x256xf32>
    %c8 = arith.constant 8 : index
    %c0_27 = arith.constant 0 : index
    %55 = vector.load %arg8[%c8, %c0_27] : memref<72x512xf32, #tpu.memory_space<vmem>>, vector<4x256xf32>
    tpu.vector_store %arg8[%c8, %c0_27], %54 {strides = array<i32>} : memref<72x512xf32, #tpu.memory_space<vmem>>, vector<4x256xf32>,
    %56 = vector.extract_strided_slice %33 {offsets = [0, 497], sizes = [4, 256], strides = [1, 1]} : vector<4x896xf32> to vector<4x256xf32>
    %cst_28 = arith.constant 0.000000e+00 : f32
    %57 = vector.shape_cast %20 : vector<1x256xi1> to vector<1x256xi1>
    %58 = vector.broadcast %57 : vector<1x256xi1> to vector<4x256xi1>
    %59 = vector.broadcast %cst_28 : f32 to vector<4x256xf32>
    %60 = arith.select %58, %56, %59 : vector<4x256xi1>, vector<4x256xf32>
    %c8_29 = arith.constant 8 : index
    %c256_30 = arith.constant 256 : index
    %61 = vector.load %arg8[%c8_29, %c256_30] : memref<72x512xf32, #tpu.memory_space<vmem>>, vector<4x256xf32>
    tpu.vector_store %arg8[%c8_29, %c256_30], %60 {strides = array<i32>} : memref<72x512xf32, #tpu.memory_space<vmem>>, vector<4x256xf32>,
    %62 = vector.extract_strided_slice %33 {offsets = [0, 127], sizes = [4, 256], strides = [1, 1]} : vector<4x896xf32> to vector<4x256xf32>
    %cst_31 = arith.constant 0.000000e+00 : f32
    %63 = vector.shape_cast %18 : vector<1x256xi1> to vector<1x256xi1>
    %64 = vector.broadcast %63 : vector<1x256xi1> to vector<4x256xi1>
    %65 = vector.broadcast %cst_31 : f32 to vector<4x256xf32>
    %66 = arith.select %64, %62, %65 : vector<4x256xi1>, vector<4x256xf32>
    %c12 = arith.constant 12 : index
    %c0_32 = arith.constant 0 : index
    %67 = vector.load %arg8[%c12, %c0_32] : memref<72x512xf32, #tpu.memory_space<vmem>>, vector<4x256xf32>
    tpu.vector_store %arg8[%c12, %c0_32], %66 {strides = array<i32>} : memref<72x512xf32, #tpu.memory_space<vmem>>, vector<4x256xf32>,
    %68 = vector.extract_strided_slice %33 {offsets = [0, 511], sizes = [4, 256], strides = [1, 1]} : vector<4x896xf32> to vector<4x256xf32>
    %cst_33 = arith.constant 0.000000e+00 : f32
    %69 = vector.shape_cast %18 : vector<1x256xi1> to vector<1x256xi1>
    %70 = vector.broadcast %69 : vector<1x256xi1> to vector<4x256xi1>
    %71 = vector.broadcast %cst_33 : f32 to vector<4x256xf32>
    %72 = arith.select %70, %68, %71 : vector<4x256xi1>, vector<4x256xf32>
    %c12_34 = arith.constant 12 : index
    %c256_35 = arith.constant 256 : index
    %73 = vector.load %arg8[%c12_34, %c256_35] : memref<72x512xf32, #tpu.memory_space<vmem>>, vector<4x256xf32>
    tpu.vector_store %arg8[%c12_34, %c256_35], %72 {strides = array<i32>} : memref<72x512xf32, #tpu.memory_space<vmem>>, vector<4x256xf32>,
    %74 = vector.extract_strided_slice %33 {offsets = [0, 128], sizes = [4, 256], strides = [1, 1]} : vector<4x896xf32> to vector<4x256xf32>
    %c16 = arith.constant 16 : index
    %c0_36 = arith.constant 0 : index
    %75 = vector.load %arg8[%c16, %c0_36] : memref<72x512xf32, #tpu.memory_space<vmem>>, vector<4x256xf32>
    tpu.vector_store %arg8[%c16, %c0_36], %74 {strides = array<i32>} : memref<72x512xf32, #tpu.memory_space<vmem>>, vector<4x256xf32>,
    %76 = vector.extract_strided_slice %33 {offsets = [0, 512], sizes = [4, 256], strides = [1, 1]} : vector<4x896xf32> to vector<4x256xf32>
    %c16_37 = arith.constant 16 : index
    %c256_38 = arith.constant 256 : index
    %77 = vector.load %arg8[%c16_37, %c256_38] : memref<72x512xf32, #tpu.memory_space<vmem>>, vector<4x256xf32>
    tpu.vector_store %arg8[%c16_37, %c256_38], %76 {strides = array<i32>} : memref<72x512xf32, #tpu.memory_space<vmem>>, vector<4x256xf32>,
    %78 = vector.extract_strided_slice %33 {offsets = [0, 129], sizes = [4, 256], strides = [1, 1]} : vector<4x896xf32> to vector<4x256xf32>
    %cst_39 = arith.constant 0.000000e+00 : f32
    %79 = vector.shape_cast %20 : vector<1x256xi1> to vector<1x256xi1>
    %80 = vector.broadcast %79 : vector<1x256xi1> to vector<4x256xi1>
    %81 = vector.broadcast %cst_39 : f32 to vector<4x256xf32>
    %82 = arith.select %80, %78, %81 : vector<4x256xi1>, vector<4x256xf32>
    %c20 = arith.constant 20 : index
    %c0_40 = arith.constant 0 : index
    %83 = vector.load %arg8[%c20, %c0_40] : memref<72x512xf32, #tpu.memory_space<vmem>>, vector<4x256xf32>
    tpu.vector_store %arg8[%c20, %c0_40], %82 {strides = array<i32>} : memref<72x512xf32, #tpu.memory_space<vmem>>, vector<4x256xf32>,
    %84 = vector.extract_strided_slice %33 {offsets = [0, 513], sizes = [4, 256], strides = [1, 1]} : vector<4x896xf32> to vector<4x256xf32>
    %cst_41 = arith.constant 0.000000e+00 : f32
    %85 = vector.shape_cast %20 : vector<1x256xi1> to vector<1x256xi1>
    %86 = vector.broadcast %85 : vector<1x256xi1> to vector<4x256xi1>
    %87 = vector.broadcast %cst_41 : f32 to vector<4x256xf32>
    %88 = arith.select %86, %84, %87 : vector<4x256xi1>, vector<4x256xf32>
    %c20_42 = arith.constant 20 : index
    %c256_43 = arith.constant 256 : index
    %89 = vector.load %arg8[%c20_42, %c256_43] : memref<72x512xf32, #tpu.memory_space<vmem>>, vector<4x256xf32>
    tpu.vector_store %arg8[%c20_42, %c256_43], %88 {strides = array<i32>} : memref<72x512xf32, #tpu.memory_space<vmem>>, vector<4x256xf32>,
    %90 = vector.extract_strided_slice %33 {offsets = [0, 143], sizes = [4, 256], strides = [1, 1]} : vector<4x896xf32> to vector<4x256xf32>
    %cst_44 = arith.constant 0.000000e+00 : f32
    %91 = vector.shape_cast %18 : vector<1x256xi1> to vector<1x256xi1>
    %92 = vector.broadcast %91 : vector<1x256xi1> to vector<4x256xi1>
    %93 = vector.broadcast %cst_44 : f32 to vector<4x256xf32>
    %94 = arith.select %92, %90, %93 : vector<4x256xi1>, vector<4x256xf32>
    %c24 = arith.constant 24 : index
    %c0_45 = arith.constant 0 : index
    %95 = vector.load %arg8[%c24, %c0_45] : memref<72x512xf32, #tpu.memory_space<vmem>>, vector<4x256xf32>
    tpu.vector_store %arg8[%c24, %c0_45], %94 {strides = array<i32>} : memref<72x512xf32, #tpu.memory_space<vmem>>, vector<4x256xf32>,
    %96 = vector.extract_strided_slice %33 {offsets = [0, 527], sizes = [4, 256], strides = [1, 1]} : vector<4x896xf32> to vector<4x256xf32>
    %cst_46 = arith.constant 0.000000e+00 : f32
    %97 = vector.shape_cast %18 : vector<1x256xi1> to vector<1x256xi1>
    %98 = vector.broadcast %97 : vector<1x256xi1> to vector<4x256xi1>
    %99 = vector.broadcast %cst_46 : f32 to vector<4x256xf32>
    %100 = arith.select %98, %96, %99 : vector<4x256xi1>, vector<4x256xf32>
    %c24_47 = arith.constant 24 : index
    %c256_48 = arith.constant 256 : index
    %101 = vector.load %arg8[%c24_47, %c256_48] : memref<72x512xf32, #tpu.memory_space<vmem>>, vector<4x256xf32>
    tpu.vector_store %arg8[%c24_47, %c256_48], %100 {strides = array<i32>} : memref<72x512xf32, #tpu.memory_space<vmem>>, vector<4x256xf32>,
    %102 = vector.extract_strided_slice %33 {offsets = [0, 144], sizes = [4, 256], strides = [1, 1]} : vector<4x896xf32> to vector<4x256xf32>
    %c28 = arith.constant 28 : index
    %c0_49 = arith.constant 0 : index
    %103 = vector.load %arg8[%c28, %c0_49] : memref<72x512xf32, #tpu.memory_space<vmem>>, vector<4x256xf32>
    tpu.vector_store %arg8[%c28, %c0_49], %102 {strides = array<i32>} : memref<72x512xf32, #tpu.memory_space<vmem>>, vector<4x256xf32>,
    %104 = vector.extract_strided_slice %33 {offsets = [0, 528], sizes = [4, 256], strides = [1, 1]} : vector<4x896xf32> to vector<4x256xf32>
    %c28_50 = arith.constant 28 : index
    %c256_51 = arith.constant 256 : index
    %105 = vector.load %arg8[%c28_50, %c256_51] : memref<72x512xf32, #tpu.memory_space<vmem>>, vector<4x256xf32>
    tpu.vector_store %arg8[%c28_50, %c256_51], %104 {strides = array<i32>} : memref<72x512xf32, #tpu.memory_space<vmem>>, vector<4x256xf32>,
    %106 = vector.extract_strided_slice %33 {offsets = [0, 145], sizes = [4, 256], strides = [1, 1]} : vector<4x896xf32> to vector<4x256xf32>
    %cst_52 = arith.constant 0.000000e+00 : f32
    %107 = vector.shape_cast %20 : vector<1x256xi1> to vector<1x256xi1>
    %108 = vector.broadcast %107 : vector<1x256xi1> to vector<4x256xi1>
    %109 = vector.broadcast %cst_52 : f32 to vector<4x256xf32>
    %110 = arith.select %108, %106, %109 : vector<4x256xi1>, vector<4x256xf32>
    %c32 = arith.constant 32 : index
    %c0_53 = arith.constant 0 : index
    %111 = vector.load %arg8[%c32, %c0_53] : memref<72x512xf32, #tpu.memory_space<vmem>>, vector<4x256xf32>
    tpu.vector_store %arg8[%c32, %c0_53], %110 {strides = array<i32>} : memref<72x512xf32, #tpu.memory_space<vmem>>, vector<4x256xf32>,
    %112 = vector.extract_strided_slice %33 {offsets = [0, 529], sizes = [4, 256], strides = [1, 1]} : vector<4x896xf32> to vector<4x256xf32>
    %cst_54 = arith.constant 0.000000e+00 : f32
    %113 = vector.shape_cast %20 : vector<1x256xi1> to vector<1x256xi1>
    %114 = vector.broadcast %113 : vector<1x256xi1> to vector<4x256xi1>
    %115 = vector.broadcast %cst_54 : f32 to vector<4x256xf32>
    %116 = arith.select %114, %112, %115 : vector<4x256xi1>, vector<4x256xf32>
    %c32_55 = arith.constant 32 : index
    %c256_56 = arith.constant 256 : index
    %117 = vector.load %arg8[%c32_55, %c256_56] : memref<72x512xf32, #tpu.memory_space<vmem>>, vector<4x256xf32>
    tpu.vector_store %arg8[%c32_55, %c256_56], %116 {strides = array<i32>} : memref<72x512xf32, #tpu.memory_space<vmem>>, vector<4x256xf32>,
    %c0_57 = arith.constant 0 : index
    %c0_58 = arith.constant 0 : index
    %118 = vector.load %arg2[%c0_57, %c0_58] : memref<16x36xf32, #tpu.memory_space<vmem>>, vector<16x36xf32>
    %c0_59 = arith.constant 0 : index
    %c0_60 = arith.constant 0 : index
    %119 = vector.load %arg8[%c0_59, %c0_60] : memref<72x512xf32, #tpu.memory_space<vmem>>, vector<36x512xf32>
    %cst_61 = arith.constant dense<0.000000e+00> : vector<16x512xf32>
    %120 = tpu.matmul %118, %119, %cst_61 {dimension_numbers = #tpu.dot_dimension_numbers<[1], [0], [0], [1], [0, 0, 1, 1], [], []>} : vector<16x36xf32>, vector<36x512xf32>, vector<16x512xf32> -> vector<16x512xf32>
    %c0_62 = arith.constant 0 : index
    %c0_63 = arith.constant 0 : index
    %121 = vector.load %arg3[%c0_62, %c0_63] : memref<16x1xf32, #tpu.memory_space<vmem>>, vector<16x1xf32>
    %122 = vector.broadcast %121 : vector<16x1xf32> to vector<16x512xf32>
    %123 = arith.addf %120, %122 : vector<16x512xf32>
    %124 = vector.extract_strided_slice %123 {offsets = [0, 0], sizes = [8, 512], strides = [1, 1]} : vector<16x512xf32> to vector<8x512xf32>
    %cst_64 = arith.constant 0.000000e+00 : f32
    %125 = vector.broadcast %cst_64 : f32 to vector<8x512xf32>
    %126 = arith.cmpf ogt, %124, %125 : vector<8x512xf32>
    %cst_65 = arith.constant 2.000000e-01 : f32
    %127 = vector.broadcast %cst_65 : f32 to vector<8x512xf32>
    %128 = arith.mulf %127, %124 : vector<8x512xf32>
    %129 = arith.select %126, %124, %128 : vector<8x512xi1>, vector<8x512xf32>
    %130 = vector.extract_strided_slice %123 {offsets = [8, 0], sizes = [8, 512], strides = [1, 1]} : vector<16x512xf32> to vector<8x512xf32>
    %131 = vector.extract_strided_slice %129 {offsets = [0, 0], sizes = [8, 256], strides = [1, 1]} : vector<8x512xf32> to vector<8x256xf32>
    %132 = vector.extract_strided_slice %129 {offsets = [0, 256], sizes = [8, 256], strides = [1, 1]} : vector<8x512xf32> to vector<8x256xf32>
    %c0_66 = arith.constant 0 : index
    %c128_67 = arith.constant 128 : index
    %133 = vector.load %arg7[%c0_66, %c128_67] : memref<8x896xf32, #tpu.memory_space<vmem>>, vector<8x256xf32>
    tpu.vector_store %arg7[%c0_66, %c128_67], %131 {strides = array<i32>} : memref<8x896xf32, #tpu.memory_space<vmem>>, vector<8x256xf32>,
    %c0_68 = arith.constant 0 : index
    %c512_69 = arith.constant 512 : index
    %134 = vector.load %arg7[%c0_68, %c512_69] : memref<8x896xf32, #tpu.memory_space<vmem>>, vector<8x256xf32>
    tpu.vector_store %arg7[%c0_68, %c512_69], %132 {strides = array<i32>} : memref<8x896xf32, #tpu.memory_space<vmem>>, vector<8x256xf32>,
    %c0_70 = arith.constant 0 : index
    %c0_71 = arith.constant 0 : index
    %135 = vector.load %arg7[%c0_70, %c0_71] : memref<8x896xf32, #tpu.memory_space<vmem>>, vector<8x896xf32>
    %136 = vector.extract_strided_slice %135 {offsets = [0, 111], sizes = [8, 256], strides = [1, 1]} : vector<8x896xf32> to vector<8x256xf32>
    %cst_72 = arith.constant 0.000000e+00 : f32
    %137 = vector.shape_cast %18 : vector<1x256xi1> to vector<1x256xi1>
    %138 = vector.broadcast %137 : vector<1x256xi1> to vector<8x256xi1>
    %139 = vector.broadcast %cst_72 : f32 to vector<8x256xf32>
    %140 = arith.select %138, %136, %139 : vector<8x256xi1>, vector<8x256xf32>
    %c0_73 = arith.constant 0 : index
    %c0_74 = arith.constant 0 : index
    %141 = vector.load %arg8[%c0_73, %c0_74] : memref<72x512xf32, #tpu.memory_space<vmem>>, vector<8x256xf32>
    tpu.vector_store %arg8[%c0_73, %c0_74], %140 {strides = array<i32>} : memref<72x512xf32, #tpu.memory_space<vmem>>, vector<8x256xf32>,
    %142 = vector.extract_strided_slice %135 {offsets = [0, 495], sizes = [8, 256], strides = [1, 1]} : vector<8x896xf32> to vector<8x256xf32>
    %cst_75 = arith.constant 0.000000e+00 : f32
    %143 = vector.shape_cast %18 : vector<1x256xi1> to vector<1x256xi1>
    %144 = vector.broadcast %143 : vector<1x256xi1> to vector<8x256xi1>
    %145 = vector.broadcast %cst_75 : f32 to vector<8x256xf32>
    %146 = arith.select %144, %142, %145 : vector<8x256xi1>, vector<8x256xf32>
    %c0_76 = arith.constant 0 : index
    %c256_77 = arith.constant 256 : index
    %147 = vector.load %arg8[%c0_76, %c256_77] : memref<72x512xf32, #tpu.memory_space<vmem>>, vector<8x256xf32>
    tpu.vector_store %arg8[%c0_76, %c256_77], %146 {strides = array<i32>} : memref<72x512xf32, #tpu.memory_space<vmem>>, vector<8x256xf32>,
    %148 = vector.extract_strided_slice %135 {offsets = [0, 112], sizes = [8, 256], strides = [1, 1]} : vector<8x896xf32> to vector<8x256xf32>
    %c8_78 = arith.constant 8 : index
    %c0_79 = arith.constant 0 : index
    %149 = vector.load %arg8[%c8_78, %c0_79] : memref<72x512xf32, #tpu.memory_space<vmem>>, vector<8x256xf32>
    tpu.vector_store %arg8[%c8_78, %c0_79], %148 {strides = array<i32>} : memref<72x512xf32, #tpu.memory_space<vmem>>, vector<8x256xf32>,
    %150 = vector.extract_strided_slice %135 {offsets = [0, 496], sizes = [8, 256], strides = [1, 1]} : vector<8x896xf32> to vector<8x256xf32>
    %c8_80 = arith.constant 8 : index
    %c256_81 = arith.constant 256 : index
    %151 = vector.load %arg8[%c8_80, %c256_81] : memref<72x512xf32, #tpu.memory_space<vmem>>, vector<8x256xf32>
    tpu.vector_store %arg8[%c8_80, %c256_81], %150 {strides = array<i32>} : memref<72x512xf32, #tpu.memory_space<vmem>>, vector<8x256xf32>,
    %152 = vector.extract_strided_slice %135 {offsets = [0, 113], sizes = [8, 256], strides = [1, 1]} : vector<8x896xf32> to vector<8x256xf32>
    %cst_82 = arith.constant 0.000000e+00 : f32
    %153 = vector.shape_cast %20 : vector<1x256xi1> to vector<1x256xi1>
    %154 = vector.broadcast %153 : vector<1x256xi1> to vector<8x256xi1>
    %155 = vector.broadcast %cst_82 : f32 to vector<8x256xf32>
    %156 = arith.select %154, %152, %155 : vector<8x256xi1>, vector<8x256xf32>
    %c16_83 = arith.constant 16 : index
    %c0_84 = arith.constant 0 : index
    %157 = vector.load %arg8[%c16_83, %c0_84] : memref<72x512xf32, #tpu.memory_space<vmem>>, vector<8x256xf32>
    tpu.vector_store %arg8[%c16_83, %c0_84], %156 {strides = array<i32>} : memref<72x512xf32, #tpu.memory_space<vmem>>, vector<8x256xf32>,
    %158 = vector.extract_strided_slice %135 {offsets = [0, 497], sizes = [8, 256], strides = [1, 1]} : vector<8x896xf32> to vector<8x256xf32>
    %cst_85 = arith.constant 0.000000e+00 : f32
    %159 = vector.shape_cast %20 : vector<1x256xi1> to vector<1x256xi1>
    %160 = vector.broadcast %159 : vector<1x256xi1> to vector<8x256xi1>
    %161 = vector.broadcast %cst_85 : f32 to vector<8x256xf32>
    %162 = arith.select %160, %158, %161 : vector<8x256xi1>, vector<8x256xf32>
    %c16_86 = arith.constant 16 : index
    %c256_87 = arith.constant 256 : index
    %163 = vector.load %arg8[%c16_86, %c256_87] : memref<72x512xf32, #tpu.memory_space<vmem>>, vector<8x256xf32>
    tpu.vector_store %arg8[%c16_86, %c256_87], %162 {strides = array<i32>} : memref<72x512xf32, #tpu.memory_space<vmem>>, vector<8x256xf32>,
    %164 = vector.extract_strided_slice %135 {offsets = [0, 127], sizes = [8, 256], strides = [1, 1]} : vector<8x896xf32> to vector<8x256xf32>
    %cst_88 = arith.constant 0.000000e+00 : f32
    %165 = vector.shape_cast %18 : vector<1x256xi1> to vector<1x256xi1>
    %166 = vector.broadcast %165 : vector<1x256xi1> to vector<8x256xi1>
    %167 = vector.broadcast %cst_88 : f32 to vector<8x256xf32>
    %168 = arith.select %166, %164, %167 : vector<8x256xi1>, vector<8x256xf32>
    %c24_89 = arith.constant 24 : index
    %c0_90 = arith.constant 0 : index
    %169 = vector.load %arg8[%c24_89, %c0_90] : memref<72x512xf32, #tpu.memory_space<vmem>>, vector<8x256xf32>
    tpu.vector_store %arg8[%c24_89, %c0_90], %168 {strides = array<i32>} : memref<72x512xf32, #tpu.memory_space<vmem>>, vector<8x256xf32>,
    %170 = vector.extract_strided_slice %135 {offsets = [0, 511], sizes = [8, 256], strides = [1, 1]} : vector<8x896xf32> to vector<8x256xf32>
    %cst_91 = arith.constant 0.000000e+00 : f32
    %171 = vector.shape_cast %18 : vector<1x256xi1> to vector<1x256xi1>
    %172 = vector.broadcast %171 : vector<1x256xi1> to vector<8x256xi1>
    %173 = vector.broadcast %cst_91 : f32 to vector<8x256xf32>
    %174 = arith.select %172, %170, %173 : vector<8x256xi1>, vector<8x256xf32>
    %c24_92 = arith.constant 24 : index
    %c256_93 = arith.constant 256 : index
    %175 = vector.load %arg8[%c24_92, %c256_93] : memref<72x512xf32, #tpu.memory_space<vmem>>, vector<8x256xf32>
    tpu.vector_store %arg8[%c24_92, %c256_93], %174 {strides = array<i32>} : memref<72x512xf32, #tpu.memory_space<vmem>>, vector<8x256xf32>,
    %176 = vector.extract_strided_slice %135 {offsets = [0, 128], sizes = [8, 256], strides = [1, 1]} : vector<8x896xf32> to vector<8x256xf32>
    %c32_94 = arith.constant 32 : index
    %c0_95 = arith.constant 0 : index
    %177 = vector.load %arg8[%c32_94, %c0_95] : memref<72x512xf32, #tpu.memory_space<vmem>>, vector<8x256xf32>
    tpu.vector_store %arg8[%c32_94, %c0_95], %176 {strides = array<i32>} : memref<72x512xf32, #tpu.memory_space<vmem>>, vector<8x256xf32>,
    %178 = vector.extract_strided_slice %135 {offsets = [0, 512], sizes = [8, 256], strides = [1, 1]} : vector<8x896xf32> to vector<8x256xf32>
    %c32_96 = arith.constant 32 : index
    %c256_97 = arith.constant 256 : index
    %179 = vector.load %arg8[%c32_96, %c256_97] : memref<72x512xf32, #tpu.memory_space<vmem>>, vector<8x256xf32>
    tpu.vector_store %arg8[%c32_96, %c256_97], %178 {strides = array<i32>} : memref<72x512xf32, #tpu.memory_space<vmem>>, vector<8x256xf32>,
    %180 = vector.extract_strided_slice %135 {offsets = [0, 129], sizes = [8, 256], strides = [1, 1]} : vector<8x896xf32> to vector<8x256xf32>
    %cst_98 = arith.constant 0.000000e+00 : f32
    %181 = vector.shape_cast %20 : vector<1x256xi1> to vector<1x256xi1>
    %182 = vector.broadcast %181 : vector<1x256xi1> to vector<8x256xi1>
    %183 = vector.broadcast %cst_98 : f32 to vector<8x256xf32>
    %184 = arith.select %182, %180, %183 : vector<8x256xi1>, vector<8x256xf32>
    %c40 = arith.constant 40 : index
    %c0_99 = arith.constant 0 : index
    %185 = vector.load %arg8[%c40, %c0_99] : memref<72x512xf32, #tpu.memory_space<vmem>>, vector<8x256xf32>
    tpu.vector_store %arg8[%c40, %c0_99], %184 {strides = array<i32>} : memref<72x512xf32, #tpu.memory_space<vmem>>, vector<8x256xf32>,
    %186 = vector.extract_strided_slice %135 {offsets = [0, 513], sizes = [8, 256], strides = [1, 1]} : vector<8x896xf32> to vector<8x256xf32>
    %cst_100 = arith.constant 0.000000e+00 : f32
    %187 = vector.shape_cast %20 : vector<1x256xi1> to vector<1x256xi1>
    %188 = vector.broadcast %187 : vector<1x256xi1> to vector<8x256xi1>
    %189 = vector.broadcast %cst_100 : f32 to vector<8x256xf32>
    %190 = arith.select %188, %186, %189 : vector<8x256xi1>, vector<8x256xf32>
    %c40_101 = arith.constant 40 : index
    %c256_102 = arith.constant 256 : index
    %191 = vector.load %arg8[%c40_101, %c256_102] : memref<72x512xf32, #tpu.memory_space<vmem>>, vector<8x256xf32>
    tpu.vector_store %arg8[%c40_101, %c256_102], %190 {strides = array<i32>} : memref<72x512xf32, #tpu.memory_space<vmem>>, vector<8x256xf32>,
    %192 = vector.extract_strided_slice %135 {offsets = [0, 143], sizes = [8, 256], strides = [1, 1]} : vector<8x896xf32> to vector<8x256xf32>
    %cst_103 = arith.constant 0.000000e+00 : f32
    %193 = vector.shape_cast %18 : vector<1x256xi1> to vector<1x256xi1>
    %194 = vector.broadcast %193 : vector<1x256xi1> to vector<8x256xi1>
    %195 = vector.broadcast %cst_103 : f32 to vector<8x256xf32>
    %196 = arith.select %194, %192, %195 : vector<8x256xi1>, vector<8x256xf32>
    %c48 = arith.constant 48 : index
    %c0_104 = arith.constant 0 : index
    %197 = vector.load %arg8[%c48, %c0_104] : memref<72x512xf32, #tpu.memory_space<vmem>>, vector<8x256xf32>
    tpu.vector_store %arg8[%c48, %c0_104], %196 {strides = array<i32>} : memref<72x512xf32, #tpu.memory_space<vmem>>, vector<8x256xf32>,
    %198 = vector.extract_strided_slice %135 {offsets = [0, 527], sizes = [8, 256], strides = [1, 1]} : vector<8x896xf32> to vector<8x256xf32>
    %cst_105 = arith.constant 0.000000e+00 : f32
    %199 = vector.shape_cast %18 : vector<1x256xi1> to vector<1x256xi1>
    %200 = vector.broadcast %199 : vector<1x256xi1> to vector<8x256xi1>
    %201 = vector.broadcast %cst_105 : f32 to vector<8x256xf32>
    %202 = arith.select %200, %198, %201 : vector<8x256xi1>, vector<8x256xf32>
    %c48_106 = arith.constant 48 : index
    %c256_107 = arith.constant 256 : index
    %203 = vector.load %arg8[%c48_106, %c256_107] : memref<72x512xf32, #tpu.memory_space<vmem>>, vector<8x256xf32>
    tpu.vector_store %arg8[%c48_106, %c256_107], %202 {strides = array<i32>} : memref<72x512xf32, #tpu.memory_space<vmem>>, vector<8x256xf32>,
    %204 = vector.extract_strided_slice %135 {offsets = [0, 144], sizes = [8, 256], strides = [1, 1]} : vector<8x896xf32> to vector<8x256xf32>
    %c56 = arith.constant 56 : index
    %c0_108 = arith.constant 0 : index
    %205 = vector.load %arg8[%c56, %c0_108] : memref<72x512xf32, #tpu.memory_space<vmem>>, vector<8x256xf32>
    tpu.vector_store %arg8[%c56, %c0_108], %204 {strides = array<i32>} : memref<72x512xf32, #tpu.memory_space<vmem>>, vector<8x256xf32>,
    %206 = vector.extract_strided_slice %135 {offsets = [0, 528], sizes = [8, 256], strides = [1, 1]} : vector<8x896xf32> to vector<8x256xf32>
    %c56_109 = arith.constant 56 : index
    %c256_110 = arith.constant 256 : index
    %207 = vector.load %arg8[%c56_109, %c256_110] : memref<72x512xf32, #tpu.memory_space<vmem>>, vector<8x256xf32>
    tpu.vector_store %arg8[%c56_109, %c256_110], %206 {strides = array<i32>} : memref<72x512xf32, #tpu.memory_space<vmem>>, vector<8x256xf32>,
    %208 = vector.extract_strided_slice %135 {offsets = [0, 145], sizes = [8, 256], strides = [1, 1]} : vector<8x896xf32> to vector<8x256xf32>
    %cst_111 = arith.constant 0.000000e+00 : f32
    %209 = vector.shape_cast %20 : vector<1x256xi1> to vector<1x256xi1>
    %210 = vector.broadcast %209 : vector<1x256xi1> to vector<8x256xi1>
    %211 = vector.broadcast %cst_111 : f32 to vector<8x256xf32>
    %212 = arith.select %210, %208, %211 : vector<8x256xi1>, vector<8x256xf32>
    %c64 = arith.constant 64 : index
    %c0_112 = arith.constant 0 : index
    %213 = vector.load %arg8[%c64, %c0_112] : memref<72x512xf32, #tpu.memory_space<vmem>>, vector<8x256xf32>
    tpu.vector_store %arg8[%c64, %c0_112], %212 {strides = array<i32>} : memref<72x512xf32, #tpu.memory_space<vmem>>, vector<8x256xf32>,
    %214 = vector.extract_strided_slice %135 {offsets = [0, 529], sizes = [8, 256], strides = [1, 1]} : vector<8x896xf32> to vector<8x256xf32>
    %cst_113 = arith.constant 0.000000e+00 : f32
    %215 = vector.shape_cast %20 : vector<1x256xi1> to vector<1x256xi1>
    %216 = vector.broadcast %215 : vector<1x256xi1> to vector<8x256xi1>
    %217 = vector.broadcast %cst_113 : f32 to vector<8x256xf32>
    %218 = arith.select %216, %214, %217 : vector<8x256xi1>, vector<8x256xf32>
    %c64_114 = arith.constant 64 : index
    %c256_115 = arith.constant 256 : index
    %219 = vector.load %arg8[%c64_114, %c256_115] : memref<72x512xf32, #tpu.memory_space<vmem>>, vector<8x256xf32>
    tpu.vector_store %arg8[%c64_114, %c256_115], %218 {strides = array<i32>} : memref<72x512xf32, #tpu.memory_space<vmem>>, vector<8x256xf32>,
    %c0_116 = arith.constant 0 : index
    %c0_117 = arith.constant 0 : index
    %220 = vector.load %arg4[%c0_116, %c0_117] : memref<8x72xf32, #tpu.memory_space<vmem>>, vector<8x72xf32>
    %c0_118 = arith.constant 0 : index
    %c0_119 = arith.constant 0 : index
    %221 = vector.load %arg8[%c0_118, %c0_119] : memref<72x512xf32, #tpu.memory_space<vmem>>, vector<72x512xf32>
    %cst_120 = arith.constant dense<0.000000e+00> : vector<8x512xf32>
    %222 = tpu.matmul %220, %221, %cst_120 {dimension_numbers = #tpu.dot_dimension_numbers<[1], [0], [0], [1], [0, 0, 1, 1], [], []>} : vector<8x72xf32>, vector<72x512xf32>, vector<8x512xf32> -> vector<8x512xf32>
    %c0_121 = arith.constant 0 : index
    %c0_122 = arith.constant 0 : index
    %223 = vector.load %arg5[%c0_121, %c0_122] : memref<8x1xf32, #tpu.memory_space<vmem>>, vector<8x1xf32>
    %224 = vector.broadcast %223 : vector<8x1xf32> to vector<8x512xf32>
    %225 = arith.addf %222, %224 : vector<8x512xf32>
    %226 = arith.addf %225, %130 : vector<8x512xf32>
    %cst_123 = arith.constant 0.000000e+00 : f32
    %227 = vector.broadcast %cst_123 : f32 to vector<8x512xf32>
    %228 = arith.cmpf ogt, %226, %227 : vector<8x512xf32>
    %cst_124 = arith.constant 2.000000e-01 : f32
    %229 = vector.broadcast %cst_124 : f32 to vector<8x512xf32>
    %230 = arith.mulf %229, %226 : vector<8x512xf32>
    %231 = arith.select %228, %226, %230 : vector<8x512xi1>, vector<8x512xf32>
    %232 = vector.extract_strided_slice %231 {offsets = [0, 0], sizes = [8, 256], strides = [1, 1]} : vector<8x512xf32> to vector<8x256xf32>
    %c0_125 = arith.constant 0 : index
    %c0_126 = arith.constant 0 : index
    %c0_127 = arith.constant 0 : index
    %233 = vector.load %arg6[%c0_125, %c0_126, %c0_127] : memref<2x8x256xf32, #tpu.memory_space<vmem>>, vector<1x8x256xf32>
    %234 = vector.shape_cast %233 : vector<1x8x256xf32> to vector<8x256xf32>
    %235 = vector.shape_cast %232 : vector<8x256xf32> to vector<1x8x256xf32>
    tpu.vector_store %arg6[%c0_125, %c0_126, %c0_127], %235 {strides = array<i32>} : memref<2x8x256xf32, #tpu.memory_space<vmem>>, vector<1x8x256xf32>,
    %236 = vector.extract_strided_slice %231 {offsets = [0, 256], sizes = [8, 256], strides = [1, 1]} : vector<8x512xf32> to vector<8x256xf32>
    %c1_128 = arith.constant 1 : index
    %c0_129 = arith.constant 0 : index
    %c0_130 = arith.constant 0 : index
    %237 = vector.load %arg6[%c1_128, %c0_129, %c0_130] : memref<2x8x256xf32, #tpu.memory_space<vmem>>, vector<1x8x256xf32>
    %238 = vector.shape_cast %237 : vector<1x8x256xf32> to vector<8x256xf32>
    %239 = vector.shape_cast %236 : vector<8x256xf32> to vector<1x8x256xf32>
    tpu.vector_store %arg6[%c1_128, %c0_129, %c0_130], %239 {strides = array<i32>} : memref<2x8x256xf32, #tpu.memory_space<vmem>>, vector<1x8x256xf32>,
    return
  }
  func.func @transform_0(%arg0: i32) -> (i32, i32, i32) {
    %c0_i32 = arith.constant 0 : i32
    %c0_i32_0 = arith.constant 0 : i32
    %c0_i32_1 = arith.constant 0 : i32
    return %arg0, %c0_i32, %c0_i32_0 : i32, i32, i32
  }
  func.func @transform_1(%arg0: i32) -> (i32, i32) {
    %c0_i32 = arith.constant 0 : i32
    %c0_i32_0 = arith.constant 0 : i32
    %c0_i32_1 = arith.constant 0 : i32
    return %c0_i32, %c0_i32_0 : i32, i32
  }
  func.func @transform_2(%arg0: i32) -> (i32, i32) {
    %c0_i32 = arith.constant 0 : i32
    %c0_i32_0 = arith.constant 0 : i32
    %c0_i32_1 = arith.constant 0 : i32
    return %c0_i32, %c0_i32_0 : i32, i32
  }
  func.func @transform_3(%arg0: i32) -> (i32, i32) {
    %c0_i32 = arith.constant 0 : i32
    %c0_i32_0 = arith.constant 0 : i32
    %c0_i32_1 = arith.constant 0 : i32
    return %c0_i32, %c0_i32_0 : i32, i32
  }
  func.func @transform_4(%arg0: i32) -> (i32, i32) {
    %c0_i32 = arith.constant 0 : i32
    %c0_i32_0 = arith.constant 0 : i32
    %c0_i32_1 = arith.constant 0 : i32
    return %c0_i32, %c0_i32_0 : i32, i32
  }
  func.func @transform_5(%arg0: i32) -> (i32, i32, i32) {
    %c0_i32 = arith.constant 0 : i32
    %c0_i32_0 = arith.constant 0 : i32
    %c0_i32_1 = arith.constant 0 : i32
    return %arg0, %c0_i32, %c0_i32_0 : i32, i32, i32
  }
}

</mosaic_0001>

<bundles_post_ra>
// kernel: tpu_custom_call.1
= control target key start
LH: loop header
LB: loop body
LE: loop exit
PB: predicated region body
PF: predicated region fallthrough
CT: control target
= control target key end

     0   :  { %10 = vsyncpa [#allocation5], 0  ;;  %s1693_s0 = inlined_call_operand.vmem [shape: f32[2,4,256], index: 0, kind: input, shape index: {}]   ;;  %s1694_s1 = inlined_call_operand.hbm [shape: f32[16,36], index: 1, kind: input, shape index: {}]   ;;  %s1695_s2 = inlined_call_operand.vmem [shape: f32[16,1], index: 2, kind: input, shape index: {}]   ;;  %s1696_s3 = inlined_call_operand.vmem [shape: f32[8,72], index: 3, kind: input, shape index: {}]   ;;  %s1697_s4 = inlined_call_operand.vmem [shape: f32[8,1], index: 4, kind: input, shape index: {}]   ;;  %s1698_s5 = inlined_call_operand.hbm [shape: f32[2,8,256], index: 5, kind: output, shape index: {}]  }
   0x1   :  { %11 = vsyncpa [#allocation6], 0  ;;  %s1146_s18 = smov [#allocation4]  }
   0x2   :  { %s19_s19 = sshll.u32 %s1146_s18, 4  ;;  %s20_s19 = int_to_ptr.vmem [resolvable:$true] %s19_s19 }
   0x3   :  { %s1110_s20 = scalar_lea.vmem %s20_s19, 256  ;;  %p1115_p1 = scmp.lt.s32.totalorder %s20_s19, %s20_s19 }
   0x4   :  { %p1111_p0 = scmp.ne.s32.totalorder %s20_s19, %s1110_s20  ;;  %p1116_p2 = scmp.lt.s32.totalorder %s1110_s20, %s1110_s20 }
   0x6   :  { %p1117_p3 = por %p1116_p2, %p1115_p1 }
   0x8   :  { %p1118_p4 = pnand %p1117_p3, %p1111_p0 }
   0xa   :  { %1121 = shalt.err (!%p1118_p4)
}
   0xb   :  { %s1147_s21 = smov 128   ;;  %s1148_s22 = smov 8  }
   0xc   :  { %25 = dma.hbm_to_vmem [thread:$0]  %s1694_s1, 256, %s20_s19, [#allocation5], %s1147_s21, %s1147_s21, %s1148_s22  }
   0xd   :  { %1142 = dma.done.wait [#allocation5], 256  }
   0xe   :  { %1143 = vsyncadd [#allocation5], 4294967040  ;;  %v1149_v0 = vmov 0.0   ;;  %v69_v1 = vld [vmem:[%s1693_s0] sm:$0xff]  ;;  %v1048_v2 = vld [vmem:[%s1693_s0 + $0x8] sm:$0xff]  ;;  %s1150_s1 = smov 111   ;;  %v35_v21 = vlaneseq }
   0xf   :  { %68 = vst [vmem:[#allocation2 + $0x8] sm:$0xff] %v1149_v0  ;;  %66 = vst [vmem:[#allocation2 + $0x28] sm:$0xff] %v1149_v0  ;;  %558 = vmatprep.mubr.f32.mxu1 %v1149_v0  ;;  %481 = vmatprep.mubr.f32.mxu0 %v1149_v0  ;;  %v73_v5 = vcombine.high %v69_v1, %v69_v1  ;;  %v78_v6 = vcombine.high %v1048_v2, %v1048_v2  ;;  %s1151_s29 = smov 127   ;;  %s1152_s0 = smov 113   ;;  %v1158_v19 = vmov 0   ;;  %v385_v20 = vld [vmem:[%s1695_s2] sm:$0xff] }
  0x10   :  { %67 = vst [vmem:[#allocation2] sm:$0xff] %v1149_v0  ;;  %75 = vst [vmem:[#allocation2 + $0x30] sm:$0xf] %v69_v1  ;;  %s1153_s30 = smov 112   ;;  %s1154_s6 = smov 1   ;;  %1074 = vset.pattern.permute.xlu0 %v1158_v19  ;;  %1075 = vset.pattern.permute.xlu1 %v1158_v19  ;;  %v1277_v22 = vand.u32 127, %v35_v21 }
  0x11   :  { %80 = vst [vmem:[#allocation2 + $0x10] sm:$0xf] %v1048_v2  ;;  %76 = vst [vmem:[#allocation2 + $0x18] sm:$0xf] %v73_v5  ;;  %s1155_s7 = smov 15   ;;  %s1156_s8 = smov 17  }
  0x12   :  { %81 = vst [vmem:[#allocation2 + $0x20] sm:$0xf] %v78_v6  ;;  %s1157_s9 = smov 16   ;;  %v37_v25 = vadd.s32 128, %v1277_v22  ;;  %v42_v27 = vand.u32 15, %v1277_v22  ;;  %vm340_vm0 = vcmask 908288  }
  0x13   :  { %vm243_vm3 = vcmask 1039360   ;;  %vm404_vm4 = vcmask 1043456   ;;  %vm285_vm5 = vcmask 924672   ;;  %vm314_vm8 = vcmask 916480  }
  0x14   :  { %v49_v28 = vand.u32 15, %v37_v25  ;;  %vm1287_vm1 = vcmp.lt.s32.totalorder %v42_v27, 15  ;;  %vm1336_vm7 = vcmp.gt.s32.totalorder %v42_v27, 0  ;;  %vm198_vm9 = vcmask 7168  }
  0x15   :  { %vm169_vm10 = vcmask 121856   ;;  %vm102_vm11 = vcmask 138240   ;;  %vm137_vm12 = vcmask 130048   ;;  %vm397_vm13 = vcmask 293888  }
  0x16   :  { %v88_v3 = vld [vmem:[#allocation2 + $0x8] sm:$0xf]  ;;  %vm1291_vm2 = vcmp.lt.s32.totalorder %v49_v28, 15  ;;  %vm1320_vm6 = vcmp.gt.s32.totalorder %v49_v28, 0 }
  0x17   :  { %v1205_v4 = vld [vmem:[#allocation2] sm:$0xf]  ;;  %353 = vrot.lane.b32.xlu1 %v88_v3, %s1150_s1  ;;  %v83_v7 = vld [vmem:[#allocation2 + $0x30] sm:$0xf]  ;;  %v321_v13 = vrot.slane %v88_v3, 4 }
  0x18   :  { %338 = vrot.lane.b32.xlu0 %v1205_v4, %s1150_s1  ;;  %v86_v8 = vld [vmem:[#allocation2 + $0x10] sm:$0xf]  ;;  %233 = vst [vmem:[#allocation3 + $0x28] sm:$0xf] %v83_v7  ;;  %v84_v9 = vld [vmem:[#allocation2 + $0x18] sm:$0xf] }
  0x19   :  { %235 = vst [vmem:[#allocation3 + $0x50] sm:$0xf] %v86_v8  ;;  %v87_v10 = vld [vmem:[#allocation2 + $0x20] sm:$0xf]  ;;  %234 = vst [vmem:[#allocation3 + $0xa8] sm:$0xf] %v84_v9 }
  0x1a   :  { %236 = vst [vmem:[#allocation3] sm:$0xf] %v87_v10  ;;  %v144_v11 = vrot.slane %v1205_v4, 4  ;;  %v130_v12 = vrot.slane %v84_v9, 4  ;;  %v146_v14 = vrot.slane %v87_v10, 4  ;;  %v145_v15 = vrot.slane %v86_v8, 4 }
  0x1b   :  { %241 = vrot.lane.b32.xlu1 %v1205_v4, %s1151_s29  ;;  %v129_v16 = vrot.slane %v83_v7, 4  ;;  %v82_v17 = vld [vmem:[#allocation2 + $0x28] sm:$0xf] }
  0x1c   :  { %334 = vrot.lane.b32.xlu0 %v83_v7, %s1150_s1  ;;  %v128_v18 = vrot.slane %v82_v17, 4 }
  0x1f   :  { %263 = vrot.lane.b32.xlu1 %v88_v3, %s1151_s29 }
  0x20   :  { %336 = vrot.lane.b32.xlu0 %v84_v9, %s1150_s1 }
  0x23   :  { %349 = vrot.lane.b32.xlu1 %v86_v8, %s1150_s1 }
  0x24   :  { %239 = vrot.lane.b32.xlu0 %v84_v9, %s1151_s29 }
  0x27   :  { %351 = vrot.lane.b32.xlu1 %v87_v10, %s1150_s1 }
  0x28   :  { %261 = vrot.lane.b32.xlu0 %v87_v10, %s1151_s29 }
  0x2b   :  { %283 = vrot.lane.b32.xlu1 %v1205_v4, %s1152_s0 }
  0x2c   :  { %281 = vrot.lane.b32.xlu0 %v84_v9, %s1152_s0 }
  0x2f   :  { %298 = vrot.lane.b32.xlu1 %v88_v3, %s1152_s0 }
  0x30   :  { %296 = vrot.lane.b32.xlu0 %v87_v10, %s1152_s0 }
  0x33   :  { %259 = vrot.lane.b32.xlu1 %v86_v8, %s1151_s29 }
  0x34   :  { %237 = vrot.lane.b32.xlu0 %v83_v7, %s1151_s29 }
  0x37   :  { %294 = vrot.lane.b32.xlu1 %v86_v8, %s1152_s0 }
  0x38   :  { %279 = vrot.lane.b32.xlu0 %v83_v7, %s1152_s0 }
  0x3b   :  { %312 = vrot.lane.b32.xlu1 %v144_v11, %s1153_s30 }
  0x3c   :  { %310 = vrot.lane.b32.xlu0 %v130_v12, %s1153_s30 }
  0x3f   :  { %326 = vrot.lane.b32.xlu1 %v321_v13, %s1153_s30 }
  0x40   :  { %324 = vrot.lane.b32.xlu0 %v146_v14, %s1153_s30 }
  0x43   :  { %196 = vrot.lane.b32.xlu1 %v84_v9, %s1154_s6 }
  0x44   :  { %194 = vrot.lane.b32.xlu0 %v83_v7, %s1154_s6 }
  0x47   :  { %217 = vrot.lane.b32.xlu1 %v87_v10, %s1154_s6 }
  0x48   :  { %215 = vrot.lane.b32.xlu0 %v86_v8, %s1154_s6 }
  0x4b   :  { %322 = vrot.lane.b32.xlu1 %v145_v15, %s1153_s30 }
  0x4c   :  { %308 = vrot.lane.b32.xlu0 %v129_v16, %s1153_s30 }
  0x4f   :  { %213 = vrot.lane.b32.xlu1 %v1205_v4, %s1154_s6 }
  0x50   :  { %192 = vrot.lane.b32.xlu0 %v82_v17, %s1154_s6 }
  0x53   :  { %167 = vrot.lane.b32.xlu1 %v84_v9, %s1155_s7 }
  0x54   :  { %165 = vrot.lane.b32.xlu0 %v83_v7, %s1155_s7 }
  0x57   :  { %182 = vrot.lane.b32.xlu1 %v87_v10, %s1155_s7 }
  0x58   :  { %180 = vrot.lane.b32.xlu0 %v86_v8, %s1155_s7 }
  0x5b   :  { %178 = vrot.lane.b32.xlu1 %v1205_v4, %s1155_s7 }
  0x5c   :  { %163 = vrot.lane.b32.xlu0 %v82_v17, %s1155_s7 }
  0x5f   :  { %100 = vrot.lane.b32.xlu1 %v84_v9, %s1156_s8 }
  0x60   :  { %98 = vrot.lane.b32.xlu0 %v83_v7, %s1156_s8 }
  0x63   :  { %118 = vrot.lane.b32.xlu1 %v87_v10, %s1156_s8 }
  0x64   :  { %116 = vrot.lane.b32.xlu0 %v86_v8, %s1156_s8 }
  0x67   :  { %114 = vrot.lane.b32.xlu1 %v1205_v4, %s1156_s8 }
  0x68   :  { %96 = vrot.lane.b32.xlu0 %v82_v17, %s1156_s8 }
  0x6b   :  { %135 = vrot.lane.b32.xlu1 %v130_v12, %s1157_s9 }
  0x6c   :  { %133 = vrot.lane.b32.xlu0 %v129_v16, %s1157_s9 }
  0x6f   :  { %151 = vrot.lane.b32.xlu1 %v146_v14, %s1157_s9 }
  0x70   :  { %149 = vrot.lane.b32.xlu0 %v145_v15, %s1157_s9 }
  0x73   :  { %147 = vrot.lane.b32.xlu1 %v144_v11, %s1157_s9 }
  0x74   :  { %131 = vrot.lane.b32.xlu0 %v128_v18, %s1157_s9 }
  0x77   :  { %797 = vrot.lane.b32.xlu1 %v1149_v0, %s1150_s1 }
  0x78   :  { %389 = vperm.xlu0 %1074, %v385_v20  }
  0x7b   :  { %811 = vrot.lane.b32.xlu1 %v1149_v0, %s1150_s1 }
  0x7c   :  { %680 = vrot.lane.b32.xlu0 %v1149_v0, %s1154_s6 }
  0x7f   :  { %773 = vrot.lane.b32.xlu1 %v1149_v0, %s1153_s30 }
  0x80   :  { %652 = vrot.lane.b32.xlu0 %v1149_v0, %s1155_s7 }
  0x83   :  { %785 = vrot.lane.b32.xlu1 %v1149_v0, %s1153_s30 }
  0x87   :  { %745 = vrot.lane.b32.xlu1 %v1149_v0, %s1152_s0 }
  0x89   :  { %v354_v23 = vpop.permute.xlu1 %353 }
  0x8a   :  { %v339_v24 = vpop.permute.xlu0 %338 }
  0x8b   :  { %759 = vrot.lane.b32.xlu1 %v1149_v0, %s1152_s0 }
  0x8d   :  { %v242_v26 = vpop.permute.xlu1 %241 }
  0x8e   :  { %v335_v29 = vpop.permute.xlu0 %334 }
  0x8f   :  { %716 = vrot.lane.b32.xlu1 %v1149_v0, %s1151_s29 }
  0x91   :  { %v264_v30 = vpop.permute.xlu1 %263 }
  0x92   :  { %v337_v33 = vpop.permute.xlu0 %336 }
  0x93   :  { %731 = vrot.lane.b32.xlu1 %v1149_v0, %s1151_s29  ;;  %v341_v34 = vsel %vm340_vm0, %v335_v29, %v337_v33  ;;  %v342_v35 = vsel %vm340_vm0, %v337_v33, %v339_v24 }
  0x94   :  { %v345_v37 = vsel %vm1287_vm1, %v341_v34, 0.0  ;;  %v346_v38 = vsel %vm1291_vm2, %v342_v35, 0.0 }
  0x95   :  { %v350_v36 = vpop.permute.xlu1 %349  ;;  %347 = vst [vmem:[#allocation3 + $0x88] sm:$0xf] %v345_v37  ;;  %348 = vst [vmem:[#allocation3 + $0x70] sm:$0xf] %v346_v38 }
  0x96   :  { %v240_v39 = vpop.permute.xlu0 %239 }
  0x97   :  { %694 = vrot.lane.b32.xlu1 %v1149_v0, %s1154_s6  ;;  %v245_v40 = vsel %vm243_vm3, %v240_v39, %v242_v26 }
  0x98   :  { %v249_v42 = vsel %vm1291_vm2, %v245_v40, 0.0 }
  0x99   :  { %v352_v41 = vpop.permute.xlu1 %351  ;;  %v253_v45 = vrot.slane %v249_v42, 4 }
  0x9a   :  { %v355_v43 = vsel %vm340_vm0, %v350_v36, %v352_v41  ;;  %v356_v44 = vsel %vm340_vm0, %v352_v41, %v354_v23  ;;  %v262_v48 = vpop.permute.xlu0 %261 }
  0x9b   :  { %v359_v46 = vsel %vm1287_vm1, %v355_v43, 0.0  ;;  %v360_v47 = vsel %vm1291_vm2, %v356_v44, 0.0  ;;  %666 = vrot.lane.b32.xlu1 %v1149_v0, %s1155_s7  ;;  %257 = vst [vmem:[#allocation3 + $0xa8] sm:$0xf0] %v253_v45  ;;  %v266_v49 = vsel %vm243_vm3, %v262_v48, %v264_v30 }
  0x9c   :  { %361 = vst [vmem:[#allocation3 + $0xc0] sm:$0xf] %v359_v46  ;;  %362 = vst [vmem:[#allocation3 + $0x68] sm:$0xf] %v360_v47  ;;  %v270_v51 = vsel %vm1291_vm2, %v266_v49, 0.0 }
  0x9d   :  { %v284_v50 = vpop.permute.xlu1 %283  ;;  %v382_v52 = vld [vmem:[#allocation3 + $0x70] sm:$0xf]  ;;  %v381_v53 = vld [vmem:[#allocation3 + $0x88] sm:$0xf]  ;;  %v274_v54 = vrot.slane %v270_v51, 4 }
  0x9e   :  { %1049 = vmatprep.subr.msk.mxu0 %vm404_vm4, %v382_v52  ;;  %v282_v56 = vpop.permute.xlu0 %281 }
  0x9f   :  { %1050 = vmatpush1.msk.msra.mxu0 %vm404_vm4, %v381_v53  ;;  %278 = vst [vmem:[#allocation3] sm:$0xf0] %v274_v54  ;;  %v287_v57 = vsel %vm285_vm5, %v282_v56, %v284_v50 }
  0xa0   :  { %v291_v59 = vsel %vm1320_vm6, %v287_v57, 0.0 }
  0xa1   :  { %v299_v58 = vpop.permute.xlu1 %298  ;;  %293 = vst [vmem:[#allocation3 + $0xf0] sm:$0xf] %v291_v59 }
  0xa2   :  { %v297_v62 = vpop.permute.xlu0 %296  ;;  %v374_v59 = vld [vmem:[#allocation3 + $0xa8] sm:$0xff] }
  0xa3   :  { %v384_v60 = vld [vmem:[#allocation3 + $0x68] sm:$0xf]  ;;  %v383_v61 = vld [vmem:[#allocation3 + $0xc0] sm:$0xf]  ;;  %v301_v63 = vsel %vm285_vm5, %v297_v62, %v299_v58 }
  0xa4   :  { %1053 = vmatprep.subr.msk.mxu1 %vm404_vm4, %v384_v60  ;;  %v305_v2 = vsel %vm1320_vm6, %v301_v63, 0.0 }
  0xa5   :  { %v260_v1 = vpop.permute.xlu1 %259  ;;  %1054 = vmatpush1.msk.msra.mxu1 %vm404_vm4, %v383_v61  ;;  %307 = vst [vmem:[#allocation3 + $0x78] sm:$0xf] %v305_v2 }
  0xa6   :  { %v265_v3 = vsel %vm243_vm3, %v260_v1, %v262_v48  ;;  %v238_v6 = vpop.permute.xlu0 %237  ;;  %v376_v51 = vld [vmem:[#allocation3] sm:$0xff] }
  0xa7   :  { %v269_v4 = vsel %vm1287_vm1, %v265_v3, 0.0  ;;  %v244_v8 = vsel %vm243_vm3, %v238_v6, %v240_v39 }
  0xa8   :  { %v273_v5 = vrot.slane %v269_v4, 4  ;;  %v248_v10 = vsel %vm1287_vm1, %v244_v8, 0.0 }
  0xa9   :  { %v295_v9 = vpop.permute.xlu1 %294  ;;  %v252_v12 = vrot.slane %v248_v10, 4 }
  0xaa   :  { %277 = vst [vmem:[#allocation3 + $0x50] sm:$0xf0] %v273_v5  ;;  %v300_v11 = vsel %vm285_vm5, %v295_v9, %v297_v62  ;;  %v280_v14 = vpop.permute.xlu0 %279 }
  0xab   :  { %v304_v13 = vsel %vm1336_vm7, %v300_v11, 0.0  ;;  %256 = vst [vmem:[#allocation3 + $0x28] sm:$0xf0] %v252_v12  ;;  %v286_v15 = vsel %vm285_vm5, %v280_v14, %v282_v56 }
  0xac   :  { %306 = vst [vmem:[#allocation3 + $0xb0] sm:$0xf] %v304_v13  ;;  %v290_v17 = vsel %vm1336_vm7, %v286_v15, 0.0 }
  0xad   :  { %v313_v16 = vpop.permute.xlu1 %312  ;;  %292 = vst [vmem:[#allocation3 + $0x108] sm:$0xf] %v290_v17 }
  0xae   :  { %v311_v18 = vpop.permute.xlu0 %310 }
  0xaf   :  { %v316_v19 = vsel %vm314_vm8, %v311_v18, %v313_v16 }
  0xb0   :  { %320 = vst [vmem:[#allocation3 + $0xf0] sm:$0xf0] %v316_v19 }
  0xb1   :  { %v327_v20 = vpop.permute.xlu1 %326  ;;  %v375_v53 = vld [vmem:[#allocation3 + $0x50] sm:$0xff] }
  0xb2   :  { %v325_v21 = vpop.permute.xlu0 %324  ;;  %v373_v60 = vld [vmem:[#allocation3 + $0x28] sm:$0xff] }
  0xb3   :  { %v329_v22 = vsel %vm314_vm8, %v325_v21, %v327_v20 }
  0xb4   :  { %333 = vst [vmem:[#allocation3 + $0x78] sm:$0xf0] %v329_v22 }
  0xb5   :  { %v197_v23 = vpop.permute.xlu1 %196 }
  0xb6   :  { %v195_v24 = vpop.permute.xlu0 %194 }
  0xb7   :  { %v200_v25 = vsel %vm198_vm9, %v195_v24, %v197_v23  ;;  %v378_v27 = vld [vmem:[#allocation3 + $0xf0] sm:$0xff] }
  0xb8   :  { %v204_v28 = vsel %vm1320_vm6, %v200_v25, 0.0  ;;  %441 = vmatprep.subr.mxu0 %v378_v27 }
  0xb9   :  { %v218_v26 = vpop.permute.xlu1 %217  ;;  %v208_v29 = vrot.slane %v204_v28, 4 }
  0xba   :  { %v216_v30 = vpop.permute.xlu0 %215 }
  0xbb   :  { %212 = vst [vmem:[#allocation3 + $0xe8] sm:$0xf0] %v208_v29  ;;  %v220_v33 = vsel %vm198_vm9, %v216_v30, %v218_v26  ;;  %v380_v35 = vld [vmem:[#allocation3 + $0x78] sm:$0xff] }
  0xbc   :  { %v224_v36 = vsel %vm1320_vm6, %v220_v33, 0.0  ;;  %518 = vmatprep.subr.mxu1 %v380_v35 }
  0xbd   :  { %v323_v34 = vpop.permute.xlu1 %322  ;;  %v228_v38 = vrot.slane %v224_v36, 4 }
  0xbe   :  { %v328_v37 = vsel %vm314_vm8, %v323_v34, %v325_v21  ;;  %v309_v39 = vpop.permute.xlu0 %308 }
  0xbf   :  { %332 = vst [vmem:[#allocation3 + $0xb0] sm:$0xf0] %v328_v37  ;;  %232 = vst [vmem:[#allocation3 + $0xd0] sm:$0xf0] %v228_v38  ;;  %v315_v40 = vsel %vm314_vm8, %v309_v39, %v311_v18 }
  0xc0   :  { %319 = vst [vmem:[#allocation3 + $0x108] sm:$0xf0] %v315_v40  ;;  %v363_v40 = vld [vmem:[#allocation4] sm:$0xff] }
  0xc1   :  { %v214_v41 = vpop.permute.xlu1 %213 }
  0xc2   :  { %v219_v42 = vsel %vm198_vm9, %v214_v41, %v216_v30  ;;  %v193_v45 = vpop.permute.xlu0 %192 }
  0xc3   :  { %v223_v43 = vsel %vm1336_vm7, %v219_v42, 0.0  ;;  %v199_v46 = vsel %vm198_vm9, %v193_v45, %v195_v24 }
  0xc4   :  { %v227_v44 = vrot.slane %v223_v43, 4  ;;  %v203_v48 = vsel %vm1336_vm7, %v199_v46, 0.0  ;;  %v364_v43 = vld [vmem:[#allocation4 + $0x8] sm:$0xff] }
  0xc5   :  { %v168_v47 = vpop.permute.xlu1 %167  ;;  %v207_v50 = vrot.slane %v203_v48, 4 }
  0xc6   :  { %231 = vst [vmem:[#allocation3 + $0x118] sm:$0xf0] %v227_v44  ;;  %v379_v49 = vld [vmem:[#allocation3 + $0xb0] sm:$0xff]  ;;  %v166_v52 = vpop.permute.xlu0 %165 }
  0xc7   :  { %519 = vmatpush1.msra.mxu1 %v379_v49  ;;  %211 = vst [vmem:[#allocation3 + $0x60] sm:$0xf0] %v207_v50  ;;  %v171_v54 = vsel %vm169_vm10, %v166_v52, %v168_v47  ;;  %v377_v57 = vld [vmem:[#allocation3 + $0x108] sm:$0xff] }
  0xc8   :  { %520 = vmatprep.subr.mxu1 %v376_v51  ;;  %v175_v58 = vsel %vm1291_vm2, %v171_v54, 0.0  ;;  %442 = vmatpush1.msra.mxu0 %v377_v57 }
  0xc9   :  { %521 = vmatpush1.msra.mxu1 %v375_v53  ;;  %v183_v56 = vpop.permute.xlu1 %182  ;;  %177 = vst [vmem:[#allocation3 + $0xe8] sm:$0xf] %v175_v58  ;;  %443 = vmatprep.subr.mxu0 %v374_v59 }
  0xca   :  { %444 = vmatpush1.msra.mxu0 %v373_v60  ;;  %v181_v61 = vpop.permute.xlu0 %180 }
  0xcb   :  { %v185_v62 = vsel %vm169_vm10, %v181_v61, %v183_v56 }
  0xcc   :  { %v189_v1 = vsel %vm1291_vm2, %v185_v62, 0.0 }
  0xcd   :  { %v179_v63 = vpop.permute.xlu1 %178  ;;  %191 = vst [vmem:[#allocation3 + $0xd0] sm:$0xf] %v189_v1 }
  0xce   :  { %v184_v2 = vsel %vm169_vm10, %v179_v63, %v181_v61  ;;  %v164_v4 = vpop.permute.xlu0 %163 }
  0xcf   :  { %v188_v3 = vsel %vm1287_vm1, %v184_v2, 0.0  ;;  %v170_v5 = vsel %vm169_vm10, %v164_v4, %v166_v52  ;;  %v858_v4 = vld [vmem:[%s1697_s4] sm:$0xff] }
  0xd0   :  { %190 = vst [vmem:[#allocation3 + $0x118] sm:$0xf] %v188_v3  ;;  %v174_v8 = vsel %vm1287_vm1, %v170_v5, 0.0  ;;  %v370_v9 = vld [vmem:[#allocation3 + $0xe8] sm:$0xff]  ;;  %v386_v5 = vld [vmem:[%s1695_s2 + $0x8] sm:$0xff] }
  0xd1   :  { %v101_v6 = vpop.permute.xlu1 %100  ;;  %176 = vst [vmem:[#allocation3 + $0x60] sm:$0xf] %v174_v8  ;;  %445 = vmatprep.subr.mxu0 %v370_v9 }
  0xd2   :  { %v99_v10 = vpop.permute.xlu0 %98 }
  0xd3   :  { %v104_v11 = vsel %vm102_vm11, %v99_v10, %v101_v6 }
  0xd4   :  { %v108_v13 = vsel %vm1320_vm6, %v104_v11, 0.0  ;;  %v372_v14 = vld [vmem:[#allocation3 + $0xd0] sm:$0xff] }
  0xd5   :  { %v119_v12 = vpop.permute.xlu1 %118  ;;  %110 = vst [vmem:[#allocation3 + $0x18] sm:$0xf] %v108_v13  ;;  %522 = vmatprep.subr.mxu1 %v372_v14 }
  0xd6   :  { %v117_v16 = vpop.permute.xlu0 %116 }
  0xd7   :  { %v371_v15 = vld [vmem:[#allocation3 + $0x118] sm:$0xff]  ;;  %v121_v17 = vsel %vm102_vm11, %v117_v16, %v119_v12 }
  0xd8   :  { %523 = vmatpush1.msra.mxu1 %v371_v15  ;;  %v125_v19 = vsel %vm1320_vm6, %v121_v17, 0.0  ;;  %v369_v21 = vld [vmem:[#allocation3 + $0x60] sm:$0xff] }
  0xd9   :  { %v115_v18 = vpop.permute.xlu1 %114  ;;  %127 = vst [vmem:[#allocation3 + $0xe0] sm:$0xf] %v125_v19  ;;  %446 = vmatpush1.msra.mxu0 %v369_v21 }
  0xda   :  { %v120_v20 = vsel %vm102_vm11, %v115_v18, %v117_v16  ;;  %v97_v23 = vpop.permute.xlu0 %96 }
  0xdb   :  { %v124_v22 = vsel %vm1336_vm7, %v120_v20, 0.0  ;;  %v103_v24 = vsel %vm102_vm11, %v97_v23, %v99_v10 }
  0xdc   :  { %126 = vst [vmem:[#allocation3 + $0xd8] sm:$0xf] %v124_v22  ;;  %v107_v26 = vsel %vm1336_vm7, %v103_v24, 0.0 }
  0xdd   :  { %v136_v25 = vpop.permute.xlu1 %135  ;;  %109 = vst [vmem:[#allocation3 + $0x100] sm:$0xf] %v107_v26 }
  0xde   :  { %v134_v27 = vpop.permute.xlu0 %133 }
  0xdf   :  { %v139_v28 = vsel %vm137_vm12, %v134_v27, %v136_v25 }
  0xe0   :  { %143 = vst [vmem:[#allocation3 + $0x18] sm:$0xf0] %v139_v28 }
  0xe1   :  { %v152_v29 = vpop.permute.xlu1 %151 }
  0xe2   :  { %v150_v30 = vpop.permute.xlu0 %149 }
  0xe3   :  { %v154_v33 = vsel %vm137_vm12, %v150_v30, %v152_v29 }
  0xe4   :  { %158 = vst [vmem:[#allocation3 + $0xe0] sm:$0xf0] %v154_v33 }
  0xe5   :  { %v148_v34 = vpop.permute.xlu1 %147 }
  0xe6   :  { %v153_v35 = vsel %vm137_vm12, %v148_v34, %v150_v30  ;;  %v132_v36 = vpop.permute.xlu0 %131 }
  0xe7   :  { %157 = vst [vmem:[#allocation3 + $0xd8] sm:$0xf0] %v153_v35  ;;  %v138_v37 = vsel %vm137_vm12, %v132_v36, %v134_v27  ;;  %v366_v38 = vld [vmem:[#allocation3 + $0x18] sm:$0xff] }
  0xe8   :  { %142 = vst [vmem:[#allocation3 + $0x100] sm:$0xf0] %v138_v37  ;;  %447 = vmatprep.subr.mxu0 %v366_v38 }
  0xe9   :  { %v798_v62 = vpop.permute.xlu1 %797 }
  0xeb   :  { %v368_v39 = vld [vmem:[#allocation3 + $0xe0] sm:$0xff] }
  0xec   :  { %524 = vmatprep.subr.mxu1 %v368_v39 }
  0xed   :  { %v1473_v63 = vpop.permute.xlu1 %811 }
  0xee   :  { %v367_v41 = vld [vmem:[#allocation3 + $0xd8] sm:$0xff] }
  0xef   :  { %525 = vmatpush1.msra.mxu1 %v367_v41  ;;  %v365_v42 = vld [vmem:[#allocation3 + $0x100] sm:$0xff] }
  0xf0   :  { %1055 = vmatmul.mubr.msk.f32.vlgmr.msra.gmra.mxu1 %vm397_vm13, %v363_v40  ;;  %448 = vmatpush1.msra.mxu0 %v365_v42 }
  0xf1   :  { %564 = vmatprep.mubr.f32.mxu1 %v1149_v0  ;;  %1051 = vmatmul.mubr.msk.f32.vlgmr.msra.gmra.mxu0 %vm397_vm13, %v363_v40  ;;  %v1477_v1 = vpop.permute.xlu1 %773 }
  0xf2   :  { %487 = vmatprep.mubr.f32.mxu0 %v1149_v0 }
  0xf3   :  { %v390_v44 = vpop.permute.xlu0 %389 }
  0xf4   :  { %1056 = vmatmul.mubr.msk.f32.gmra.mxu1 %vm397_vm13, %v364_v43 }
  0xf5   :  { %1052 = vmatmul.mubr.msk.f32.gmra.mxu0 %vm397_vm13, %v364_v43  ;;  %1003 = vmatprep.mubr.f32.mxu1 %v1149_v0  ;;  %v1483_v2 = vpop.permute.xlu1 %785 }
  0xf6   :  { %932 = vmatprep.mubr.f32.mxu0 %v1149_v0 }
  0xf7   :  { %v681_v11 = vpop.permute.xlu0 %680 }
  0xf9   :  { %v1487_v3 = vpop.permute.xlu1 %745 }
  0xfd   :  { %v1499_v6 = vpop.permute.xlu1 %759 }
 0x101   :  { %v1501_v8 = vpop.permute.xlu1 %716 }
 0x105   :  { %v1503_v9 = vpop.permute.xlu1 %731 }
 0x109   :  { %v695_v10 = vpop.permute.xlu1 %694 }
 0x10d   :  { %v667_v12 = vpop.permute.xlu1 %666 }
 0x1b0   :  { %v560_v45 = vpop.f32.mrf.mxu1 }
 0x1b1   :  { %v561_v46 = vadd.f32 %v560_v45, %v390_v44  ;;  %v483_v50 = vpop.f32.mrf.mxu0 }
 0x1b2   :  { %v562_v47 = vpop.f32.mrf.mxu1  ;;  %v484_v51 = vadd.f32 %v483_v50, %v390_v44 }
 0x1b3   :  { %vm573_vm14 = vcmp.gt.f32.partialorder %v561_v46, 0.0  ;;  %v577_v48 = vmul.f32 0.2, %v561_v46  ;;  %v563_v49 = vadd.f32 %v562_v47, %v390_v44  ;;  %v485_v54 = vpop.f32.mrf.mxu0 }
 0x1b4   :  { %vm571_vm4 = vcmp.gt.f32.partialorder %v484_v51, 0.0  ;;  %v575_v56 = vmul.f32 0.2, %v484_v51  ;;  %v486_v57 = vadd.f32 %v485_v54, %v390_v44 }
 0x1b5   :  { %v1397_v52 = vsel %vm573_vm14, %v561_v46, %v577_v48  ;;  %vm574_vm15 = vcmp.gt.f32.partialorder %v563_v49, 0.0  ;;  %v578_v53 = vmul.f32 0.2, %v563_v49 }
 0x1b6   :  { %585 = vst [vmem:[#allocation2 + $0x10] sm:$0xff] %v1397_v52  ;;  %807 = vrot.lane.b32.xlu1 %v1397_v52, %s1150_s1  ;;  %710 = vst [vmem:[#allocation3 + $0xc0] sm:$0xff] %v1397_v52  ;;  %v1406_v59 = vsel %vm571_vm4, %v484_v51, %v575_v56  ;;  %vm572_vm13 = vcmp.gt.f32.partialorder %v486_v57, 0.0  ;;  %v576_v60 = vmul.f32 0.2, %v486_v57 }
 0x1b7   :  { %v1403_v58 = vsel %vm574_vm15, %v563_v49, %v578_v53  ;;  %583 = vst [vmem:[#allocation2 + $0x30] sm:$0xff] %v1406_v59  ;;  %793 = vrot.lane.b32.xlu0 %v1406_v59, %s1150_s1  ;;  %708 = vst [vmem:[#allocation3 + $0x88] sm:$0xff] %v1406_v59 }
 0x1b8   :  { %586 = vst [vmem:[#allocation2 + $0x20] sm:$0xff] %v1403_v58  ;;  %711 = vst [vmem:[#allocation3 + $0x68] sm:$0xff] %v1403_v58  ;;  %v1413_v61 = vsel %vm572_vm13, %v486_v57, %v576_v60 }
 0x1b9   :  { %584 = vst [vmem:[#allocation2 + $0x18] sm:$0xff] %v1413_v61  ;;  %709 = vst [vmem:[#allocation3 + $0x70] sm:$0xff] %v1413_v61 }
 0x1ba   :  { %781 = vrot.lane.b32.xlu1 %v1397_v52, %s1153_s30 }
 0x1bb   :  { %769 = vrot.lane.b32.xlu0 %v1406_v59, %s1153_s30 }
 0x1be   :  { %755 = vrot.lane.b32.xlu1 %v1397_v52, %s1152_s0 }
 0x1bf   :  { %741 = vrot.lane.b32.xlu0 %v1406_v59, %s1152_s0 }
 0x1c2   :  { %727 = vrot.lane.b32.xlu1 %v1397_v52, %s1151_s29 }
 0x1c3   :  { %712 = vrot.lane.b32.xlu0 %v1406_v59, %s1151_s29 }
 0x1c6   :  { %795 = vrot.lane.b32.xlu1 %v1413_v61, %s1150_s1 }
 0x1c7   :  { %682 = vrot.lane.b32.xlu0 %v1406_v59, %s1154_s6 }
 0x1ca   :  { %640 = vrot.lane.b32.xlu1 %v1149_v0, %s1157_s9 }
 0x1cb   :  { %696 = vrot.lane.b32.xlu0 %v1397_v52, %s1154_s6 }
 0x1ce   :  { %684 = vrot.lane.b32.xlu1 %v1413_v61, %s1154_s6 }
 0x1cf   :  { %654 = vrot.lane.b32.xlu0 %v1406_v59, %s1155_s7 }
 0x1d2   :  { %698 = vrot.lane.b32.xlu1 %v1403_v58, %s1154_s6 }
 0x1d3   :  { %668 = vrot.lane.b32.xlu0 %v1397_v52, %s1155_s7 }
 0x1d6   :  { %656 = vrot.lane.b32.xlu1 %v1413_v61, %s1155_s7 }
 0x1d7   :  { %630 = vrot.lane.b32.xlu0 %v1406_v59, %s1157_s9 }
 0x1da   :  { %670 = vrot.lane.b32.xlu1 %v1403_v58, %s1155_s7 }
 0x1db   :  { %642 = vrot.lane.b32.xlu0 %v1397_v52, %s1157_s9 }
 0x1de   :  { %632 = vrot.lane.b32.xlu1 %v1413_v61, %s1157_s9 }
 0x1df   :  { %599 = vrot.lane.b32.xlu0 %v1406_v59, %s1156_s8 }
 0x1e2   :  { %644 = vrot.lane.b32.xlu1 %v1403_v58, %s1157_s9 }
 0x1e3   :  { %809 = vrot.lane.b32.xlu0 %v1403_v58, %s1150_s1 }
 0x1e6   :  { %601 = vrot.lane.b32.xlu1 %v1413_v61, %s1156_s8 }
 0x1e7   :  { %771 = vrot.lane.b32.xlu0 %v1413_v61, %s1153_s30 }
 0x1ea   :  { %618 = vrot.lane.b32.xlu1 %v1403_v58, %s1156_s8 }
 0x1eb   :  { %783 = vrot.lane.b32.xlu0 %v1403_v58, %s1153_s30 }
 0x1ee   :  { %614 = vrot.lane.b32.xlu1 %v1149_v0, %s1156_s8 }
 0x1ef   :  { %743 = vrot.lane.b32.xlu0 %v1413_v61, %s1152_s0 }
 0x1f2   :  { %861 = vperm.xlu1 %1075, %v858_v4  }
 0x1f3   :  { %757 = vrot.lane.b32.xlu0 %v1403_v58, %s1152_s0 }
 0x1f7   :  { %714 = vrot.lane.b32.xlu0 %v1413_v61, %s1151_s29 }
 0x1fb   :  { %729 = vrot.lane.b32.xlu0 %v1403_v58, %s1151_s29 }
 0x1ff   :  { %616 = vrot.lane.b32.xlu0 %v1397_v52, %s1156_s8 }
 0x203   :  { %628 = vrot.lane.b32.xlu0 %v1149_v0, %s1157_s9 }
 0x207   :  { %597 = vrot.lane.b32.xlu0 %v1149_v0, %s1156_s8  ;;  %v653_v0 = vpop.permute.xlu0 %652 }
 0x20b   :  { %394 = vperm.xlu0 %1074, %v386_v5  }
 0x228   :  { %v808_v13 = vpop.permute.xlu1 %807 }
 0x229   :  { %v794_v14 = vpop.permute.xlu0 %793 }
 0x22c   :  { %v1505_v15 = vpop.permute.xlu1 %781 }
 0x22d   :  { %v1507_v16 = vpop.permute.xlu0 %769 }
 0x230   :  { %v1509_v17 = vpop.permute.xlu1 %755 }
 0x231   :  { %v1511_v18 = vpop.permute.xlu0 %741 }
 0x234   :  { %v1513_v19 = vpop.permute.xlu1 %727 }
 0x235   :  { %v1515_v20 = vpop.permute.xlu0 %712 }
 0x238   :  { %v796_v21 = vpop.permute.xlu1 %795 }
 0x239   :  { %v799_v22 = vsel %vm340_vm0, %v794_v14, %v796_v21  ;;  %v800_v23 = vsel %vm340_vm0, %v796_v21, %v798_v62  ;;  %v683_v24 = vpop.permute.xlu0 %682 }
 0x23a   :  { %1078 = vmatprep.subr.msk.mxu0 %vm1291_vm2, %v800_v23  ;;  %v1522_v25 = vsel %vm198_vm9, %v681_v11, %v683_v24 }
 0x23b   :  { %1079 = vmatpush1.msk.msra.mxu0 %vm1287_vm1, %v799_v22  ;;  %v690_v27 = vsel %vm1336_vm7, %v1522_v25, 0.0 }
 0x23c   :  { %v641_v26 = vpop.permute.xlu1 %640  ;;  %692 = vst [vmem:[#allocation3 + $0x108] sm:$0xff] %v690_v27 }
 0x23d   :  { %v697_v28 = vpop.permute.xlu0 %696 }
 0x23e   :  { %v1530_v29 = vsel %vm198_vm9, %v695_v10, %v697_v28 }
 0x23f   :  { %v704_v33 = vsel %vm1336_vm7, %v1530_v29, 0.0 }
 0x240   :  { %v685_v30 = vpop.permute.xlu1 %684  ;;  %706 = vst [vmem:[#allocation3 + $0xb0] sm:$0xff] %v704_v33 }
 0x241   :  { %v1536_v34 = vsel %vm198_vm9, %v683_v24, %v685_v30  ;;  %v655_v36 = vpop.permute.xlu0 %654 }
 0x242   :  { %v691_v35 = vsel %vm1320_vm6, %v1536_v34, 0.0  ;;  %v1542_v37 = vsel %vm169_vm10, %v653_v0, %v655_v36 }
 0x243   :  { %693 = vst [vmem:[#allocation3 + $0xf0] sm:$0xff] %v691_v35  ;;  %v662_v39 = vsel %vm1287_vm1, %v1542_v37, 0.0  ;;  %v489_v35 = vpop.f32.mrf.mxu0 }
 0x244   :  { %v699_v38 = vpop.permute.xlu1 %698  ;;  %664 = vst [vmem:[#allocation3 + $0x28] sm:$0xff] %v662_v39 }
 0x245   :  { %v1548_v40 = vsel %vm198_vm9, %v697_v28, %v699_v38  ;;  %v669_v42 = vpop.permute.xlu0 %668  ;;  %v491_v39 = vpop.f32.mrf.mxu0 }
 0x246   :  { %v705_v41 = vsel %vm1320_vm6, %v1548_v40, 0.0  ;;  %v1554_v43 = vsel %vm169_vm10, %v667_v12, %v669_v42 }
 0x247   :  { %707 = vst [vmem:[#allocation3 + $0x78] sm:$0xff] %v705_v41  ;;  %v676_v45 = vsel %vm1287_vm1, %v1554_v43, 0.0 }
 0x248   :  { %v657_v44 = vpop.permute.xlu1 %656  ;;  %678 = vst [vmem:[#allocation3 + $0x50] sm:$0xff] %v676_v45 }
 0x249   :  { %v1560_v46 = vsel %vm169_vm10, %v655_v36, %v657_v44  ;;  %v1565_v48 = vpop.permute.xlu0 %630 }
 0x24a   :  { %v663_v47 = vsel %vm1291_vm2, %v1560_v46, 0.0 }
 0x24b   :  { %665 = vst [vmem:[#allocation3 + $0xa8] sm:$0xff] %v663_v47 }
 0x24c   :  { %v671_v49 = vpop.permute.xlu1 %670 }
 0x24d   :  { %v1568_v50 = vsel %vm169_vm10, %v669_v42, %v671_v49  ;;  %v643_v53 = vpop.permute.xlu0 %642 }
 0x24e   :  { %v677_v51 = vsel %vm1291_vm2, %v1568_v50, 0.0  ;;  %v1574_v54 = vsel %vm137_vm12, %v641_v26, %v643_v53 }
 0x24f   :  { %679 = vst [vmem:[#allocation3] sm:$0xff] %v677_v51  ;;  %650 = vst [vmem:[#allocation3 + $0x118] sm:$0xff] %v1574_v54 }
 0x250   :  { %v633_v56 = vpop.permute.xlu1 %632 }
 0x251   :  { %v635_v57 = vsel %vm137_vm12, %v1565_v48, %v633_v56  ;;  %v1579_v60 = vpop.permute.xlu0 %599 }
 0x252   :  { %639 = vst [vmem:[#allocation3 + $0xe8] sm:$0xff] %v635_v57 }
 0x254   :  { %v645_v62 = vpop.permute.xlu1 %644 }
 0x255   :  { %v1582_v4 = vsel %vm137_vm12, %v643_v53, %v645_v62  ;;  %v810_v5 = vpop.permute.xlu0 %809 }
 0x256   :  { %651 = vst [vmem:[#allocation3 + $0xd0] sm:$0xff] %v1582_v4  ;;  %v813_v10 = vsel %vm340_vm0, %v808_v13, %v810_v5  ;;  %v814_v11 = vsel %vm340_vm0, %v810_v5, %v1473_v63  ;;  %vm864_vm0 = vcmask 588800  }
 0x257   :  { %1080 = vmatprep.subr.msk.mxu1 %vm1291_vm2, %v814_v11 }
 0x258   :  { %v602_v12 = vpop.permute.xlu1 %601  ;;  %1081 = vmatpush1.msk.msra.mxu1 %vm1287_vm1, %v813_v10 }
 0x259   :  { %v604_v0 = vsel %vm102_vm11, %v1579_v60, %v602_v12  ;;  %v772_v21 = vpop.permute.xlu0 %771 }
 0x25a   :  { %v608_v14 = vsel %vm1320_vm6, %v604_v0, 0.0  ;;  %v775_v13 = vsel %vm314_vm8, %v1507_v16, %v772_v21  ;;  %v776_v63 = vsel %vm314_vm8, %v772_v21, %v1477_v1 }
 0x25b   :  { %610 = vst [vmem:[#allocation3 + $0x18] sm:$0xff] %v608_v14  ;;  %884 = vmatprep.subr.mxu0 %v776_v63 }
 0x25c   :  { %885 = vmatpush1.msra.mxu0 %v775_v13  ;;  %v619_v30 = vpop.permute.xlu1 %618 }
 0x25d   :  { %v784_v22 = vpop.permute.xlu0 %783 }
 0x25e   :  { %v787_v23 = vsel %vm314_vm8, %v1505_v15, %v784_v22  ;;  %v788_v24 = vsel %vm314_vm8, %v784_v22, %v1483_v2 }
 0x25f   :  { %955 = vmatprep.subr.mxu1 %v788_v24 }
 0x260   :  { %956 = vmatpush1.msra.mxu1 %v787_v23 }
 0x261   :  { %v744_v26 = vpop.permute.xlu0 %743 }
 0x262   :  { %v747_v27 = vsel %vm285_vm5, %v1511_v18, %v744_v26  ;;  %v748_v16 = vsel %vm285_vm5, %v744_v26, %v1487_v3 }
 0x263   :  { %1082 = vmatprep.subr.msk.mxu0 %vm1320_vm6, %v748_v16 }
 0x264   :  { %1083 = vmatpush1.msk.msra.mxu0 %vm1336_vm7, %v747_v27 }
 0x265   :  { %v758_v1 = vpop.permute.xlu0 %757 }
 0x266   :  { %v761_v15 = vsel %vm285_vm5, %v1509_v17, %v758_v1  ;;  %v762_v2 = vsel %vm285_vm5, %v758_v1, %v1499_v6 }
 0x267   :  { %1084 = vmatprep.subr.msk.mxu1 %vm1320_vm6, %v762_v2 }
 0x268   :  { %1085 = vmatpush1.msk.msra.mxu1 %vm1336_vm7, %v761_v15 }
 0x269   :  { %v715_v18 = vpop.permute.xlu0 %714 }
 0x26a   :  { %v718_v3 = vsel %vm243_vm3, %v1515_v20, %v715_v18  ;;  %v719_v28 = vsel %vm243_vm3, %v715_v18, %v1501_v8  ;;  %v615_v20 = vpop.permute.xlu1 %614 }
 0x26b   :  { %1086 = vmatprep.subr.msk.mxu0 %vm1291_vm2, %v719_v28 }
 0x26c   :  { %1087 = vmatpush1.msk.msra.mxu0 %vm1287_vm1, %v718_v3 }
 0x26d   :  { %v730_v17 = vpop.permute.xlu0 %729  ;;  %890 = vmatprep.subr.mxu0 %v1413_v61 }
 0x26e   :  { %v733_v6 = vsel %vm243_vm3, %v1513_v19, %v730_v17  ;;  %v734_v33 = vsel %vm243_vm3, %v730_v17, %v1503_v9  ;;  %891 = vmatpush1.msra.mxu0 %v1406_v59  ;;  %v862_v38 = vpop.permute.xlu1 %861 }
 0x26f   :  { %1088 = vmatprep.subr.msk.mxu0 %vm1320_vm6, %v1536_v34  ;;  %1089 = vmatprep.subr.msk.mxu1 %vm1291_vm2, %v734_v33  ;;  %v566_v34 = vpop.f32.mrf.mxu1 }
 0x270   :  { %1090 = vmatpush1.msk.msra.mxu0 %vm1336_vm7, %v1522_v25  ;;  %1091 = vmatpush1.msk.msra.mxu1 %vm1287_vm1, %v733_v6 }
 0x271   :  { %v617_v8 = vpop.permute.xlu0 %616  ;;  %1092 = vmatprep.subr.msk.mxu0 %vm1291_vm2, %v1560_v46  ;;  %961 = vmatprep.subr.mxu1 %v1403_v58  ;;  %v568_v36 = vpop.f32.mrf.mxu1 }
 0x272   :  { %v620_v61 = vsel %vm102_vm11, %v615_v20, %v617_v8  ;;  %v621_v9 = vsel %vm102_vm11, %v617_v8, %v619_v30  ;;  %1093 = vmatpush1.msk.msra.mxu0 %vm1287_vm1, %v1542_v37  ;;  %962 = vmatpush1.msra.mxu1 %v1397_v52 }
 0x273   :  { %v624_v59 = vsel %vm1336_vm7, %v620_v61, 0.0  ;;  %v625_v19 = vsel %vm1320_vm6, %v621_v9, 0.0  ;;  %896 = vmatprep.subr.mxu0 %v635_v57  ;;  %1094 = vmatprep.subr.msk.mxu1 %vm1320_vm6, %v1548_v40 }
 0x274   :  { %626 = vst [vmem:[#allocation3 + $0xd8] sm:$0xff] %v624_v59  ;;  %627 = vst [vmem:[#allocation3 + $0xe0] sm:$0xff] %v625_v19  ;;  %1095 = vmatpush1.msk.msra.mxu1 %vm1336_vm7, %v1530_v29  ;;  %v821_v29 = vld [vmem:[%s1696_s3] sm:$0xff]  ;;  %s1159_s3 = smov [#allocation7]  }
 0x275   :  { %v629_v58 = vpop.permute.xlu0 %628  ;;  %1096 = vmatprep.subr.msk.mxu1 %vm1291_vm2, %v1568_v50  ;;  %s1036_s16 = sshll.u32 %s1159_s3, 4  ;;  %s1037_s16 = int_to_ptr.vmem [resolvable:$true] %s1036_s16 }
 0x276   :  { %v634_v25 = vsel %vm137_vm12, %v629_v58, %v1565_v48  ;;  %1097 = vmatpush1.msk.msra.mxu1 %vm1287_vm1, %v1554_v43  ;;  %s1122_s17 = scalar_lea.vmem %s1037_s16, 512  ;;  %p1127_p6 = scmp.lt.s32.totalorder %s1037_s16, %s1037_s16 }
 0x277   :  { %638 = vst [vmem:[#allocation3 + $0x60] sm:$0xff] %v634_v25  ;;  %897 = vmatpush1.msra.mxu0 %v634_v25  ;;  %967 = vmatprep.subr.mxu1 %v1582_v4  ;;  %p1123_p5 = scmp.ne.s32.totalorder %s1037_s16, %s1122_s17  ;;  %p1128_p7 = scmp.lt.s32.totalorder %s1122_s17, %s1122_s17 }
 0x278   :  { %1098 = vmatprep.subr.msk.mxu0 %vm1320_vm6, %v604_v0  ;;  %968 = vmatpush1.msra.mxu1 %v1574_v54 }
 0x279   :  { %v598_v52 = vpop.permute.xlu0 %597  ;;  %1099 = vmatprep.subr.msk.mxu1 %vm1320_vm6, %v621_v9  ;;  %p1129_p8 = por %p1128_p7, %p1127_p6 }
 0x27a   :  { %v603_v32 = vsel %vm102_vm11, %v598_v52, %v1579_v60  ;;  %1100 = vmatpush1.msk.msra.mxu1 %vm1336_vm7, %v620_v61 }
 0x27b   :  { %v607_v31 = vsel %vm1336_vm7, %v603_v32, 0.0  ;;  %1101 = vmatpush1.msk.msra.mxu0 %vm1336_vm7, %v603_v32  ;;  %1058 = vmatmul.mubr.msk.f32.vlgmr.msra.gmra.mxu1 %vm864_vm0, %v821_v29  ;;  %p1130_p9 = pnand %p1129_p8, %p1123_p5 }
 0x27c   :  { %609 = vst [vmem:[#allocation3 + $0x100] sm:$0xff] %v607_v31  ;;  %1057 = vmatmul.mubr.msk.f32.vlgmr.msra.gmra.mxu0 %vm864_vm0, %v821_v29 }
 0x286   :  { %v395_v37 = vpop.permute.xlu0 %394 }
 0x287   :  { %v567_v40 = vadd.f32 %v566_v34, %v395_v37  ;;  %v490_v43 = vadd.f32 %v489_v35, %v395_v37  ;;  %v569_v46 = vadd.f32 %v568_v36, %v395_v37  ;;  %v492_v49 = vadd.f32 %v491_v39, %v395_v37 }
 0x33b   :  { %v1005_v55 = vpop.f32.mrf.mxu1 }
 0x33c   :  { %v1006_v41 = vadd.f32 %v1005_v55, %v862_v38  ;;  %v934_v42 = vpop.f32.mrf.mxu0 }
 0x33d   :  { %v935_v44 = vadd.f32 %v934_v42, %v862_v38  ;;  %v1007_v45 = vpop.f32.mrf.mxu1 }
 0x33e   :  { %v1012_v47 = vadd.f32 %v1006_v41, %v567_v40  ;;  %v1008_v48 = vadd.f32 %v1007_v45, %v862_v38  ;;  %v936_v7 = vpop.f32.mrf.mxu0 }
 0x33f   :  { %v1010_v50 = vadd.f32 %v935_v44, %v490_v43  ;;  %v937_v51 = vadd.f32 %v936_v7, %v862_v38 }
 0x340   :  { %vm1016_vm1 = vcmp.gt.f32.partialorder %v1012_v47, 0.0  ;;  %v1020_v53 = vmul.f32 0.2, %v1012_v47  ;;  %v1013_v54 = vadd.f32 %v1008_v48, %v569_v46 }
 0x341   :  { %vm1014_vm2 = vcmp.gt.f32.partialorder %v1010_v50, 0.0  ;;  %v1018_v56 = vmul.f32 0.2, %v1010_v50  ;;  %v1011_v57 = vadd.f32 %v937_v51, %v492_v49 }
 0x342   :  { %v1024_v60 = vsel %vm1016_vm1, %v1012_v47, %v1020_v53  ;;  %vm1017_vm3 = vcmp.gt.f32.partialorder %v1013_v54, 0.0  ;;  %v1021_v62 = vmul.f32 0.2, %v1013_v54 }
 0x343   :  { %1029 = vst [vmem:[#allocation7 + $0x10] sm:$0xff] %v1024_v60  ;;  %v1022_v4 = vsel %vm1014_vm2, %v1010_v50, %v1018_v56  ;;  %vm1015_vm5 = vcmp.gt.f32.partialorder %v1011_v57, 0.0  ;;  %v1019_v5 = vmul.f32 0.2, %v1011_v57 }
 0x344   :  { %1026 = vst [vmem:[#allocation7] sm:$0xff] %v1022_v4  ;;  %v1025_v10 = vsel %vm1017_vm3, %v1013_v54, %v1021_v62 }
 0x345   :  { %1030 = vst [vmem:[#allocation7 + $0x18] sm:$0xff] %v1025_v10  ;;  %v1023_v11 = vsel %vm1015_vm5, %v1011_v57, %v1019_v5 }
 0x346   :  { %1027 = vst [vmem:[#allocation7 + $0x8] sm:$0xff] %v1023_v11 }
 0x347   :  { %1133 = shalt.err (!%p1130_p9)
}
 0x348   :  { %s1160_s18 = smov 256  }
 0x349   :  { %1042 = dma.vmem_to_hbm [thread:$0]  %s1037_s16, 512, %s1698_s5, [#allocation6], %s1160_s18, %s1160_s18, %s1157_s9  }
 0x34a   :  { %1144 = dma.done.wait [#allocation6], 512  }
 0x34b   :  { %1145 = vsyncadd [#allocation6], 4294966784 }
 0x34c   :  { %1046 = vsyncpa [#allocation5], 1 }
 0x34d   :  { %1047 = vsyncpa [#allocation6], 1 }

</bundles_post_ra>
